<compile_context>
chip_gen: v7x
topology: tpu7x:2x2x1
jax: 0.10.0
libtpu: 0.0.40
codegen_flags: <defaults>
</compile_context>

<pallas_src>
import math
import functools

import jax
import jax.numpy as jnp
from jax import lax
from jax.experimental import pallas as pl
from jax.experimental.pallas import tpu as pltpu


def _attn_kernel(x_ref, mask_ref, wqkv_ref, bqkv_ref,
                 qg_ref, qb_ref, kg_ref, kb_ref,
                 ctx_ref, key_ref, val_ref,
                 *, num_heads, head_dim, hidden, tb, eps, compute_dtype):
    S = x_ref.shape[1]
    M = tb * S                 # rows fed to the fused projection matmul
    BH = tb * num_heads        # batch dim of the attention matmuls

    x2d = x_ref[...].reshape(M, hidden).astype(compute_dtype)

    # ---- Fused QKV projection: one large MXU op -------------------------------
    qkv = jnp.dot(x2d, wqkv_ref[...],
                  preferred_element_type=jnp.float32) + bqkv_ref[...]  # (M, 3H) f32

    q = qkv[:, :hidden]
    k = qkv[:, hidden:2 * hidden]
    v = qkv[:, 2 * hidden:3 * hidden]

    # value_layer: single lane-dense (TB, S, hidden) store.
    val_ref[...] = v.reshape(tb, S, hidden).astype(val_ref.dtype)

    # ---- Per-head LayerNorm, batched over all (token, head) pairs -------------
    def head_ln(z, gamma, beta):          # z: (M, hidden); gamma/beta: (1, D)
        z = z.reshape(M, num_heads, head_dim)
        mu = jnp.mean(z, axis=-1, keepdims=True)
        var = jnp.mean((z - mu) ** 2, axis=-1, keepdims=True)
        return (z - mu) * lax.rsqrt(var + eps) * gamma + beta          # (M, nH, D)

    # q_gamma/q_beta already carry the 1/sqrt(D) factor (folded in the wrapper).
    q_ln = head_ln(q, qg_ref[...], qb_ref[...])
    k_ln = head_ln(k, kg_ref[...], kb_ref[...])

    # key_layer: lane-dense store straight from the (TB, S, nH*D) layout.
    key_ref[...] = k_ln.reshape(tb, S, hidden).astype(key_ref.dtype)

    # ---- Batched attention: two einsums over one (TB*nH) batch dim -------------
    def to_heads(z):                      # (M, nH, D) -> (TB*nH, S, D)
        return (z.reshape(tb, S, num_heads, head_dim)
                 .transpose(0, 2, 1, 3)
                 .reshape(BH, S, head_dim))

    qh = to_heads(q_ln).astype(compute_dtype)
    kh = to_heads(k_ln).astype(compute_dtype)
    vh = to_heads(v.reshape(M, num_heads, head_dim)).astype(compute_dtype)

    # scores = qh @ kh^T (contract last dims; no explicit transpose of kh).
    scores = jnp.einsum('bqd,bkd->bqk', qh, kh,
                        preferred_element_type=jnp.float32)            # (BH, S, S)
    # Additive mask broadcast once over heads/queries.
    scores = scores.reshape(tb, num_heads, S, S) + mask_ref[...]       # (TB,1,1,S) bcast

    # Numerically-stable softmax over keys.
    scores = scores - jnp.max(scores, axis=-1, keepdims=True)
    p = jnp.exp(scores)
    denom = jnp.sum(p, axis=-1, keepdims=True)
    r = pl.reciprocal(denom, approx=True)          # EUP vrcp
    r = r * (2.0 - denom * r)                      # one Newton step -> full f32 precision
    p = (p * r).reshape(BH, S, S)

    ctx = jnp.einsum('bqk,bkd->bqd', p.astype(compute_dtype), vh,
                     preferred_element_type=jnp.float32)               # (BH, S, D)

    # context_layer: back to (TB, S, hidden), one lane-dense store.
    ctx = (ctx.reshape(tb, num_heads, S, head_dim)
              .transpose(0, 2, 1, 3)
              .reshape(tb, S, hidden))
    ctx_ref[...] = ctx.astype(ctx_ref.dtype)


def _pick_batch_tile(B, S, target_m=256):
    # Largest TB dividing B with TB*S <= max(target_m, S).  No ">= 2 grid steps"
    # cap: v5e/v6e are single-TC so the grid is a serial loop and bigger TB just
    # fills the MXU rows better.  (On v7x, pass batch_tile explicitly if you want
    # >= 2 grid steps for the two TensorCores.)
    best = 1
    for tb in range(1, B + 1):
        if B % tb == 0 and tb * S <= max(target_m, S):
            best = tb
    return best


def blip2_qformer_attention(hidden_states, attention_mask, params, num_heads,
                            layer_norm_eps=1e-12, compute_dtype=jnp.float32,
                            batch_tile=None):
    """Self-attention forward of Blip2QFormerMultiHeadAttention (eval mode).

    Returns (context_layer, (key_layer, value_layer)) matching the PyTorch module.
    For production shapes on v6e/v7x use compute_dtype=jnp.bfloat16 (MXU operands
    only; accumulation and LN/softmax stay f32).
    """
    B, S, hidden = hidden_states.shape
    assert hidden % num_heads == 0
    D = hidden // num_heads
    assert attention_mask.shape == (B, 1, 1, S), "expects HF additive mask (B,1,1,S)"
    # TODO(synk): cross-attention / past_key_value-concat / relative-position /
    # head_mask / dropout branches of forward are not implemented (not exercised here).

    TB = batch_tile if batch_tile is not None else _pick_batch_tile(B, S)
    assert B % TB == 0

    # Fused QKV weight/bias (weights already transposed to (in, out)).
    wqkv = jnp.concatenate([params["wq_t"], params["wk_t"], params["wv_t"]],
                           axis=1).astype(compute_dtype)          # (hidden, 3*hidden)
    bqkv = jnp.concatenate([params["bq"], params["bk"], params["bv"]],
                           axis=1).astype(jnp.float32)            # (1, 3*hidden)

    # Fold 1/sqrt(D) into q_norm's affine params (q is never an output).
    inv_sqrt_d = 1.0 / math.sqrt(D)
    qg = (params["q_gamma"] * inv_sqrt_d).astype(jnp.float32)
    qb = (params["q_beta"] * inv_sqrt_d).astype(jnp.float32)
    kg = params["k_gamma"].astype(jnp.float32)
    kb = params["k_beta"].astype(jnp.float32)

    kernel = functools.partial(_attn_kernel,
                               num_heads=num_heads, head_dim=D, hidden=hidden,
                               tb=TB, eps=layer_norm_eps, compute_dtype=compute_dtype)

    inv = lambda shape: pl.BlockSpec(shape, lambda b: tuple(0 for _ in shape))

    grid_spec = pltpu.PrefetchScalarGridSpec(
        num_scalar_prefetch=0,
        grid=(B // TB,),
        in_specs=[
            pl.BlockSpec((TB, S, hidden), lambda b: (b, 0, 0)),    # hidden_states
            pl.BlockSpec((TB, 1, 1, S), lambda b: (b, 0, 0, 0)),   # additive mask
            inv((hidden, 3 * hidden)), inv((1, 3 * hidden)),       # fused Wqkv^T, bqkv
            inv((1, D)), inv((1, D)),                              # q_norm gamma/beta (pre-scaled)
            inv((1, D)), inv((1, D)),                              # k_norm gamma/beta
        ],
        out_specs=[
            pl.BlockSpec((TB, S, hidden), lambda b: (b, 0, 0)),    # context (B,S,hidden)
            pl.BlockSpec((TB, S, hidden), lambda b: (b, 0, 0)),    # key, heads on lanes
            pl.BlockSpec((TB, S, hidden), lambda b: (b, 0, 0)),    # value, heads on lanes
        ],
    )

    out_shapes = (
        jax.ShapeDtypeStruct((B, S, hidden), jnp.float32),
        jax.ShapeDtypeStruct((B, S, hidden), jnp.float32),
        jax.ShapeDtypeStruct((B, S, hidden), jnp.float32),
    )

    # Advisory cost estimate for XLA's scheduler around the custom call.
    c_item = jnp.dtype(compute_dtype).itemsize
    flops = (2 * B * S * hidden * 3 * hidden            # fused QKV projection
             + 2 * 2 * B * num_heads * S * S * D        # scores + context matmuls
             + 12 * B * S * hidden)                     # LN / softmax elementwise (approx)
    transcendentals = B * num_heads * S * S             # exp
    bytes_accessed = (B * S * hidden * 4 + B * S * 4
                      + hidden * 3 * hidden * c_item + 3 * hidden * 4 + 4 * D * 4
                      + 3 * B * S * hidden * 4)
    cost = pl.CostEstimate(flops=int(flops),
                           transcendentals=int(transcendentals),
                           bytes_accessed=int(bytes_accessed))

    # VMEM budget: double-buffered blocks + invariant operands + body temporaries,
    # clamped so the request stays valid on v7x (64 MiB physical per TC).
    step_bytes = (2 * (TB * S * hidden * 4)                         # x
                  + 2 * (TB * S * 4)                                # mask
                  + 2 * (hidden * 3 * hidden * c_item + 3 * hidden * 4 + 4 * D * 4)
                  + 2 * 3 * (TB * S * hidden * 4)                   # three outputs
                  + 3 * (TB * num_heads * S * S * 4)                # scores/probs temps
                  + 2 * (TB * S * 3 * hidden * 4))                  # qkv / LN temps
    vmem_limit = int(min(max(2 * step_bytes, 32 * 1024 * 1024), 64 * 1024 * 1024))

    ctx, key_flat, val_flat = pl.pallas_call(
        kernel,
        out_shape=out_shapes,
        grid_spec=grid_spec,
        compiler_params=pltpu.CompilerParams(
            dimension_semantics=("parallel",),
            vmem_limit_bytes=vmem_limit),
        cost_estimate=cost,
    )(hidden_states, attention_mask, wqkv, bqkv, qg, qb, kg, kb)

    # Lane-dense kernel outputs -> (B, nH, S, D) past_key_value layout.  If the
    # downstream consumer can take (B, S, hidden) directly, skip this transpose to
    # save the extra HBM round-trip.
    key_layer = key_flat.reshape(B, S, num_heads, D).transpose(0, 2, 1, 3)
    value_layer = val_flat.reshape(B, S, num_heads, D).transpose(0, 2, 1, 3)

    # forward() returns (context_layer, past_key_value=(key_layer, value_layer))
    return ctx, (key_layer, value_layer)


def _reference(hidden_states, attention_mask, params, num_heads, eps=1e-12):
    B, S, hidden = hidden_states.shape
    D = hidden // num_heads

    def ln(x, g, b):
        mu = jnp.mean(x, axis=-1, keepdims=True)
        var = jnp.mean((x - mu) ** 2, axis=-1, keepdims=True)
        return (x - mu) / jnp.sqrt(var + eps) * g.reshape(-1) + b.reshape(-1)

    def split(x):  # (B,S,hidden) -> (B,nH,S,D)
        return x.reshape(B, S, num_heads, D).transpose(0, 2, 1, 3)

    q = split(hidden_states @ params["wq_t"] + params["bq"].reshape(-1))
    k = split(hidden_states @ params["wk_t"] + params["bk"].reshape(-1))
    v = split(hidden_states @ params["wv_t"] + params["bv"].reshape(-1))
    q = ln(q, params["q_gamma"], params["q_beta"])
    k = ln(k, params["k_gamma"], params["k_beta"])

    scores = jnp.einsum("bhqd,bhkd->bhqk", q, k) / math.sqrt(D)
    scores = scores + attention_mask          # (B,1,1,S) broadcasts
    probs = jax.nn.softmax(scores, axis=-1)
    ctx = jnp.einsum("bhqk,bhkd->bhqd", probs, v)
    ctx = ctx.transpose(0, 2, 1, 3).reshape(B, S, hidden)
    return ctx, (k, v)


if __name__ == "__main__":
    B, S, hidden, num_heads = 2, 8, 32, 4
    D = hidden // num_heads

    key = jax.random.PRNGKey(0)
    ks = jax.random.split(key, 10)

    hidden_states = jax.random.normal(ks[0], (B, S, hidden), dtype=jnp.float32)

    # HuggingFace-style additive attention mask: 0 for keep, -1e4 for masked-out.
    keep = (jax.random.uniform(ks[1], (B, 1, 1, S)) > 0.2).astype(jnp.float32)
    attention_mask = (1.0 - keep) * -10000.0

    scale = 0.02
    params = {
        "wq_t": scale * jax.random.normal(ks[2], (hidden, hidden), jnp.float32),
        "bq": scale * jax.random.normal(ks[3], (1, hidden), jnp.float32),
        "wk_t": scale * jax.random.normal(ks[4], (hidden, hidden), jnp.float32),
        "bk": scale * jax.random.normal(ks[5], (1, hidden), jnp.float32),
        "wv_t": scale * jax.random.normal(ks[6], (hidden, hidden), jnp.float32),
        "bv": scale * jax.random.normal(ks[7], (1, hidden), jnp.float32),
        "q_gamma": jnp.ones((1, D), jnp.float32),
        "q_beta": jnp.zeros((1, D), jnp.float32),
        "k_gamma": jnp.ones((1, D), jnp.float32),
        "k_beta": jnp.zeros((1, D), jnp.float32),
    }

    # compute_dtype=jnp.bfloat16 is the recommended production setting on v6e/v7x;
    # f32 here so the 1e-5 reference check below stays valid.
    ctx, (k_layer, v_layer) = blip2_qformer_attention(
        hidden_states, attention_mask, params, num_heads,
        compute_dtype=jnp.float32)
    jax.block_until_ready(ctx)
    jax.block_until_ready(k_layer)
    jax.block_until_ready(v_layer)

    ctx_ref, (k_ref, v_ref) = _reference(hidden_states, attention_mask, params, num_heads)
    assert jnp.allclose(ctx, ctx_ref, atol=1e-5, rtol=1e-5)
    assert jnp.allclose(k_layer, k_ref, atol=1e-5, rtol=1e-5)
    assert jnp.allclose(v_layer, v_ref, atol=1e-5, rtol=1e-5)

    print("KERNEL_OK")
</pallas_src>

<mosaic_0001>
module attributes {stable_mosaic.version = 11 : i64} {
  func.func @_attn_kernel(%arg0: i32, %arg1: memref<2x8x32xf32, #tpu.memory_space<vmem>>, %arg2: memref<2x1x1x8xf32, #tpu.memory_space<vmem>>, %arg3: memref<32x96xf32, #tpu.memory_space<vmem>>, %arg4: memref<1x96xf32, #tpu.memory_space<vmem>>, %arg5: memref<1x8xf32, #tpu.memory_space<vmem>>, %arg6: memref<1x8xf32, #tpu.memory_space<vmem>>, %arg7: memref<1x8xf32, #tpu.memory_space<vmem>>, %arg8: memref<1x8xf32, #tpu.memory_space<vmem>>, %arg9: memref<2x8x32xf32, #tpu.memory_space<vmem>>, %arg10: memref<2x8x32xf32, #tpu.memory_space<vmem>>, %arg11: memref<2x8x32xf32, #tpu.memory_space<vmem>>) attributes {dimension_semantics = [#tpu.dimension_semantics<parallel>], iteration_bounds = array<i64: 1>, scalar_prefetch = 0 : i64, scratch_operands = 0 : i64, tpu.core_type = #tpu.core_type<tc>, window_params = [{transform_indices = @transform_0, window_bounds = array<i64: 2, 8, 32>}, {transform_indices = @transform_1, window_bounds = array<i64: 2, 1, 1, 8>}, {pipeline_mode = #tpu.pipeline_mode<synchronous>, transform_indices = @transform_2, window_bounds = array<i64: 32, 96>}, {pipeline_mode = #tpu.pipeline_mode<synchronous>, transform_indices = @transform_3, window_bounds = array<i64: 1, 96>}, {pipeline_mode = #tpu.pipeline_mode<synchronous>, transform_indices = @transform_4, window_bounds = array<i64: 1, 8>}, {pipeline_mode = #tpu.pipeline_mode<synchronous>, transform_indices = @transform_5, window_bounds = array<i64: 1, 8>}, {pipeline_mode = #tpu.pipeline_mode<synchronous>, transform_indices = @transform_6, window_bounds = array<i64: 1, 8>}, {pipeline_mode = #tpu.pipeline_mode<synchronous>, transform_indices = @transform_7, window_bounds = array<i64: 1, 8>}, {transform_indices = @transform_8, window_bounds = array<i64: 2, 8, 32>}, {transform_indices = @transform_9, window_bounds = array<i64: 2, 8, 32>}, {transform_indices = @transform_10, window_bounds = array<i64: 2, 8, 32>}]} {
    %c0 = arith.constant 0 : index
    %c0_0 = arith.constant 0 : index
    %c0_1 = arith.constant 0 : index
    %0 = vector.load %arg1[%c0, %c0_0, %c0_1] : memref<2x8x32xf32, #tpu.memory_space<vmem>>, vector<2x8x32xf32>
    %1 = vector.shape_cast %0 : vector<2x8x32xf32> to vector<16x32xf32>
    %c0_2 = arith.constant 0 : index
    %c0_3 = arith.constant 0 : index
    %2 = vector.load %arg3[%c0_2, %c0_3] : memref<32x96xf32, #tpu.memory_space<vmem>>, vector<32x96xf32>
    %cst = arith.constant dense<0.000000e+00> : vector<16x96xf32>
    %3 = tpu.matmul %1, %2, %cst {dimension_numbers = #tpu.dot_dimension_numbers<[1], [0], [0], [1], [0, 0, 1, 1], [], []>} : vector<16x32xf32>, vector<32x96xf32>, vector<16x96xf32> -> vector<16x96xf32>
    %c0_4 = arith.constant 0 : index
    %c0_5 = arith.constant 0 : index
    %4 = vector.load %arg4[%c0_4, %c0_5] : memref<1x96xf32, #tpu.memory_space<vmem>>, vector<1x96xf32>
    %5 = vector.broadcast %4 : vector<1x96xf32> to vector<16x96xf32>
    %6 = arith.addf %3, %5 : vector<16x96xf32>
    %7 = vector.extract_strided_slice %6 {offsets = [0, 0], sizes = [16, 32], strides = [1, 1]} : vector<16x96xf32> to vector<16x32xf32>
    %8 = vector.extract_strided_slice %6 {offsets = [0, 32], sizes = [16, 32], strides = [1, 1]} : vector<16x96xf32> to vector<16x32xf32>
    %9 = vector.extract_strided_slice %6 {offsets = [0, 64], sizes = [16, 32], strides = [1, 1]} : vector<16x96xf32> to vector<16x32xf32>
    %10 = vector.shape_cast %9 : vector<16x32xf32> to vector<2x8x32xf32>
    %c0_6 = arith.constant 0 : index
    %c0_7 = arith.constant 0 : index
    %c0_8 = arith.constant 0 : index
    %11 = vector.load %arg11[%c0_6, %c0_7, %c0_8] : memref<2x8x32xf32, #tpu.memory_space<vmem>>, vector<2x8x32xf32>
    tpu.vector_store %arg11[%c0_6, %c0_7, %c0_8], %10 {strides = array<i32>} : memref<2x8x32xf32, #tpu.memory_space<vmem>>, vector<2x8x32xf32>,
    %c0_9 = arith.constant 0 : index
    %c0_10 = arith.constant 0 : index
    %12 = vector.load %arg5[%c0_9, %c0_10] : memref<1x8xf32, #tpu.memory_space<vmem>>, vector<1x8xf32>
    %c0_11 = arith.constant 0 : index
    %c0_12 = arith.constant 0 : index
    %13 = vector.load %arg6[%c0_11, %c0_12] : memref<1x8xf32, #tpu.memory_space<vmem>>, vector<1x8xf32>
    %14 = vector.shape_cast %7 : vector<16x32xf32> to vector<16x4x8xf32>
    %cst_13 = arith.constant dense<0.000000e+00> : vector<16x4xf32>
    %15 = vector.multi_reduction <add>, %14, %cst_13 [2] : vector<16x4x8xf32> to vector<16x4xf32>
    %16 = vector.shape_cast %15 : vector<16x4xf32> to vector<16x4x1xf32>
    %cst_14 = arith.constant 8.000000e+00 : f32
    %17 = vector.broadcast %cst_14 : f32 to vector<16x4x1xf32>
    %18 = arith.divf %16, %17 : vector<16x4x1xf32>
    %19 = vector.broadcast %18 : vector<16x4x1xf32> to vector<16x4x8xf32>
    %20 = arith.subf %14, %19 : vector<16x4x8xf32>
    %21 = arith.mulf %20, %20 : vector<16x4x8xf32>
    %cst_15 = arith.constant dense<0.000000e+00> : vector<16x4xf32>
    %22 = vector.multi_reduction <add>, %21, %cst_15 [2] : vector<16x4x8xf32> to vector<16x4xf32>
    %23 = vector.shape_cast %22 : vector<16x4xf32> to vector<16x4x1xf32>
    %cst_16 = arith.constant 8.000000e+00 : f32
    %24 = vector.broadcast %cst_16 : f32 to vector<16x4x1xf32>
    %25 = arith.divf %23, %24 : vector<16x4x1xf32>
    %26 = vector.broadcast %18 : vector<16x4x1xf32> to vector<16x4x8xf32>
    %27 = arith.subf %14, %26 : vector<16x4x8xf32>
    %cst_17 = arith.constant 9.99999996E-13 : f32
    %28 = vector.broadcast %cst_17 : f32 to vector<16x4x1xf32>
    %29 = arith.addf %25, %28 : vector<16x4x1xf32>
    %30 = math.rsqrt %29 : vector<16x4x1xf32>
    %31 = vector.broadcast %30 : vector<16x4x1xf32> to vector<16x4x8xf32>
    %32 = arith.mulf %27, %31 : vector<16x4x8xf32>
    %33 = vector.shape_cast %12 : vector<1x8xf32> to vector<1x1x8xf32>
    %34 = vector.broadcast %33 : vector<1x1x8xf32> to vector<16x4x8xf32>
    %35 = arith.mulf %32, %34 : vector<16x4x8xf32>
    %36 = vector.shape_cast %13 : vector<1x8xf32> to vector<1x1x8xf32>
    %37 = vector.broadcast %36 : vector<1x1x8xf32> to vector<16x4x8xf32>
    %38 = arith.addf %35, %37 : vector<16x4x8xf32>
    %c0_18 = arith.constant 0 : index
    %c0_19 = arith.constant 0 : index
    %39 = vector.load %arg7[%c0_18, %c0_19] : memref<1x8xf32, #tpu.memory_space<vmem>>, vector<1x8xf32>
    %c0_20 = arith.constant 0 : index
    %c0_21 = arith.constant 0 : index
    %40 = vector.load %arg8[%c0_20, %c0_21] : memref<1x8xf32, #tpu.memory_space<vmem>>, vector<1x8xf32>
    %41 = vector.shape_cast %8 : vector<16x32xf32> to vector<16x4x8xf32>
    %cst_22 = arith.constant dense<0.000000e+00> : vector<16x4xf32>
    %42 = vector.multi_reduction <add>, %41, %cst_22 [2] : vector<16x4x8xf32> to vector<16x4xf32>
    %43 = vector.shape_cast %42 : vector<16x4xf32> to vector<16x4x1xf32>
    %cst_23 = arith.constant 8.000000e+00 : f32
    %44 = vector.broadcast %cst_23 : f32 to vector<16x4x1xf32>
    %45 = arith.divf %43, %44 : vector<16x4x1xf32>
    %46 = vector.broadcast %45 : vector<16x4x1xf32> to vector<16x4x8xf32>
    %47 = arith.subf %41, %46 : vector<16x4x8xf32>
    %48 = arith.mulf %47, %47 : vector<16x4x8xf32>
    %cst_24 = arith.constant dense<0.000000e+00> : vector<16x4xf32>
    %49 = vector.multi_reduction <add>, %48, %cst_24 [2] : vector<16x4x8xf32> to vector<16x4xf32>
    %50 = vector.shape_cast %49 : vector<16x4xf32> to vector<16x4x1xf32>
    %cst_25 = arith.constant 8.000000e+00 : f32
    %51 = vector.broadcast %cst_25 : f32 to vector<16x4x1xf32>
    %52 = arith.divf %50, %51 : vector<16x4x1xf32>
    %53 = vector.broadcast %45 : vector<16x4x1xf32> to vector<16x4x8xf32>
    %54 = arith.subf %41, %53 : vector<16x4x8xf32>
    %cst_26 = arith.constant 9.99999996E-13 : f32
    %55 = vector.broadcast %cst_26 : f32 to vector<16x4x1xf32>
    %56 = arith.addf %52, %55 : vector<16x4x1xf32>
    %57 = math.rsqrt %56 : vector<16x4x1xf32>
    %58 = vector.broadcast %57 : vector<16x4x1xf32> to vector<16x4x8xf32>
    %59 = arith.mulf %54, %58 : vector<16x4x8xf32>
    %60 = vector.shape_cast %39 : vector<1x8xf32> to vector<1x1x8xf32>
    %61 = vector.broadcast %60 : vector<1x1x8xf32> to vector<16x4x8xf32>
    %62 = arith.mulf %59, %61 : vector<16x4x8xf32>
    %63 = vector.shape_cast %40 : vector<1x8xf32> to vector<1x1x8xf32>
    %64 = vector.broadcast %63 : vector<1x1x8xf32> to vector<16x4x8xf32>
    %65 = arith.addf %62, %64 : vector<16x4x8xf32>
    %66 = vector.shape_cast %65 : vector<16x4x8xf32> to vector<2x8x32xf32>
    %c0_27 = arith.constant 0 : index
    %c0_28 = arith.constant 0 : index
    %c0_29 = arith.constant 0 : index
    %67 = vector.load %arg10[%c0_27, %c0_28, %c0_29] : memref<2x8x32xf32, #tpu.memory_space<vmem>>, vector<2x8x32xf32>
    tpu.vector_store %arg10[%c0_27, %c0_28, %c0_29], %66 {strides = array<i32>} : memref<2x8x32xf32, #tpu.memory_space<vmem>>, vector<2x8x32xf32>,
    %68 = vector.shape_cast %38 : vector<16x4x8xf32> to vector<2x8x4x8xf32>
    %69 = tpu.transpose %68, [0, 2, 1, 3] : vector<2x8x4x8xf32> -> vector<2x4x8x8xf32>
    %70 = vector.shape_cast %69 : vector<2x4x8x8xf32> to vector<8x8x8xf32>
    %71 = vector.shape_cast %65 : vector<16x4x8xf32> to vector<2x8x4x8xf32>
    %72 = tpu.transpose %71, [0, 2, 1, 3] : vector<2x8x4x8xf32> -> vector<2x4x8x8xf32>
    %73 = vector.shape_cast %72 : vector<2x4x8x8xf32> to vector<8x8x8xf32>
    %74 = vector.shape_cast %9 : vector<16x32xf32> to vector<16x4x8xf32>
    %75 = vector.shape_cast %74 : vector<16x4x8xf32> to vector<2x8x4x8xf32>
    %76 = tpu.transpose %75, [0, 2, 1, 3] : vector<2x8x4x8xf32> -> vector<2x4x8x8xf32>
    %77 = vector.shape_cast %76 : vector<2x4x8x8xf32> to vector<8x8x8xf32>
    "tpu.trace_start"() <{level = 10 : i32, message = "bqd,bkd->bqk"}> : () -> ()
    %cst_30 = arith.constant dense<0.000000e+00> : vector<8x8x8xf32>
    %78 = tpu.matmul %70, %73, %cst_30 {dimension_numbers = #tpu.dot_dimension_numbers<[2], [2], [1], [1], [0, 0, 0, 1, 1, 1], [0], [0]>} : vector<8x8x8xf32>, vector<8x8x8xf32>, vector<8x8x8xf32> -> vector<8x8x8xf32>
    "tpu.trace_stop"() : () -> ()
    %79 = vector.shape_cast %78 : vector<8x8x8xf32> to vector<2x4x8x8xf32>
    %c0_31 = arith.constant 0 : index
    %c0_32 = arith.constant 0 : index
    %c0_33 = arith.constant 0 : index
    %c0_34 = arith.constant 0 : index
    %80 = vector.load %arg2[%c0_31, %c0_32, %c0_33, %c0_34] : memref<2x1x1x8xf32, #tpu.memory_space<vmem>>, vector<2x1x1x8xf32>
    %81 = vector.broadcast %80 : vector<2x1x1x8xf32> to vector<2x4x8x8xf32>
    %82 = arith.addf %79, %81 : vector<2x4x8x8xf32>
    %cst_35 = arith.constant dense<0xFF800000> : vector<2x4x8xf32>
    %83 = vector.multi_reduction <maximumf>, %82, %cst_35 [3] : vector<2x4x8x8xf32> to vector<2x4x8xf32>
    %84 = vector.shape_cast %83 : vector<2x4x8xf32> to vector<2x4x8x1xf32>
    %85 = vector.broadcast %84 : vector<2x4x8x1xf32> to vector<2x4x8x8xf32>
    %86 = arith.subf %82, %85 : vector<2x4x8x8xf32>
    %87 = math.exp %86 : vector<2x4x8x8xf32>
    %cst_36 = arith.constant dense<0.000000e+00> : vector<2x4x8xf32>
    %88 = vector.multi_reduction <add>, %87, %cst_36 [3] : vector<2x4x8x8xf32> to vector<2x4x8xf32>
    %89 = vector.shape_cast %88 : vector<2x4x8xf32> to vector<2x4x8x1xf32>
    %90 = tpu.reciprocal %89 {approx = true} : vector<2x4x8x1xf32> -> vector<2x4x8x1xf32>
    %91 = arith.mulf %89, %90 : vector<2x4x8x1xf32>
    %cst_37 = arith.constant 2.000000e+00 : f32
    %92 = vector.broadcast %cst_37 : f32 to vector<2x4x8x1xf32>
    %93 = arith.subf %92, %91 : vector<2x4x8x1xf32>
    %94 = arith.mulf %90, %93 : vector<2x4x8x1xf32>
    %95 = vector.broadcast %94 : vector<2x4x8x1xf32> to vector<2x4x8x8xf32>
    %96 = arith.mulf %87, %95 : vector<2x4x8x8xf32>
    %97 = vector.shape_cast %96 : vector<2x4x8x8xf32> to vector<8x8x8xf32>
    "tpu.trace_start"() <{level = 10 : i32, message = "bqk,bkd->bqd"}> : () -> ()
    %cst_38 = arith.constant dense<0.000000e+00> : vector<8x8x8xf32>
    %98 = tpu.matmul %97, %77, %cst_38 {dimension_numbers = #tpu.dot_dimension_numbers<[2], [1], [1], [2], [0, 0, 0, 1, 1, 2], [0], [0]>} : vector<8x8x8xf32>, vector<8x8x8xf32>, vector<8x8x8xf32> -> vector<8x8x8xf32>
    "tpu.trace_stop"() : () -> ()
    %99 = vector.shape_cast %98 : vector<8x8x8xf32> to vector<2x4x8x8xf32>
    %100 = tpu.transpose %99, [0, 2, 1, 3] : vector<2x4x8x8xf32> -> vector<2x8x4x8xf32>
    %101 = vector.shape_cast %100 : vector<2x8x4x8xf32> to vector<2x8x32xf32>
    %c0_39 = arith.constant 0 : index
    %c0_40 = arith.constant 0 : index
    %c0_41 = arith.constant 0 : index
    %102 = vector.load %arg9[%c0_39, %c0_40, %c0_41] : memref<2x8x32xf32, #tpu.memory_space<vmem>>, vector<2x8x32xf32>
    tpu.vector_store %arg9[%c0_39, %c0_40, %c0_41], %101 {strides = array<i32>} : memref<2x8x32xf32, #tpu.memory_space<vmem>>, vector<2x8x32xf32>,
    return
  }
  func.func @transform_0(%arg0: i32) -> (i32, i32, i32) {
    %c0_i32 = arith.constant 0 : i32
    %c0_i32_0 = arith.constant 0 : i32
    %c0_i32_1 = arith.constant 0 : i32
    return %arg0, %c0_i32, %c0_i32_0 : i32, i32, i32
  }
  func.func @transform_1(%arg0: i32) -> (i32, i32, i32, i32) {
    %c0_i32 = arith.constant 0 : i32
    %c0_i32_0 = arith.constant 0 : i32
    %c0_i32_1 = arith.constant 0 : i32
    %c0_i32_2 = arith.constant 0 : i32
    return %arg0, %c0_i32, %c0_i32_0, %c0_i32_1 : i32, i32, i32, i32
  }
  func.func @transform_2(%arg0: i32) -> (i32, i32) {
    %c0_i32 = arith.constant 0 : i32
    %c0_i32_0 = arith.constant 0 : i32
    %c0_i32_1 = arith.constant 0 : i32
    return %c0_i32, %c0_i32_0 : i32, i32
  }
  func.func @transform_3(%arg0: i32) -> (i32, i32) {
    %c0_i32 = arith.constant 0 : i32
    %c0_i32_0 = arith.constant 0 : i32
    %c0_i32_1 = arith.constant 0 : i32
    return %c0_i32, %c0_i32_0 : i32, i32
  }
  func.func @transform_4(%arg0: i32) -> (i32, i32) {
    %c0_i32 = arith.constant 0 : i32
    %c0_i32_0 = arith.constant 0 : i32
    %c0_i32_1 = arith.constant 0 : i32
    return %c0_i32, %c0_i32_0 : i32, i32
  }
  func.func @transform_5(%arg0: i32) -> (i32, i32) {
    %c0_i32 = arith.constant 0 : i32
    %c0_i32_0 = arith.constant 0 : i32
    %c0_i32_1 = arith.constant 0 : i32
    return %c0_i32, %c0_i32_0 : i32, i32
  }
  func.func @transform_6(%arg0: i32) -> (i32, i32) {
    %c0_i32 = arith.constant 0 : i32
    %c0_i32_0 = arith.constant 0 : i32
    %c0_i32_1 = arith.constant 0 : i32
    return %c0_i32, %c0_i32_0 : i32, i32
  }
  func.func @transform_7(%arg0: i32) -> (i32, i32) {
    %c0_i32 = arith.constant 0 : i32
    %c0_i32_0 = arith.constant 0 : i32
    %c0_i32_1 = arith.constant 0 : i32
    return %c0_i32, %c0_i32_0 : i32, i32
  }
  func.func @transform_8(%arg0: i32) -> (i32, i32, i32) {
    %c0_i32 = arith.constant 0 : i32
    %c0_i32_0 = arith.constant 0 : i32
    %c0_i32_1 = arith.constant 0 : i32
    return %arg0, %c0_i32, %c0_i32_0 : i32, i32, i32
  }
  func.func @transform_9(%arg0: i32) -> (i32, i32, i32) {
    %c0_i32 = arith.constant 0 : i32
    %c0_i32_0 = arith.constant 0 : i32
    %c0_i32_1 = arith.constant 0 : i32
    return %arg0, %c0_i32, %c0_i32_0 : i32, i32, i32
  }
  func.func @transform_10(%arg0: i32) -> (i32, i32, i32) {
    %c0_i32 = arith.constant 0 : i32
    %c0_i32_0 = arith.constant 0 : i32
    %c0_i32_1 = arith.constant 0 : i32
    return %arg0, %c0_i32, %c0_i32_0 : i32, i32, i32
  }
}

</mosaic_0001>

<bundles_post_ra>
// kernel: tpu_custom_call.1
= control target key start
LH: loop header
LB: loop body
LE: loop exit
PB: predicated region body
PF: predicated region fallthrough
CT: control target
= control target key end

     0   :  { %16 = vsyncpa [#allocation3], 0  ;;  %s4772_s0 = inlined_call_operand.hbm [shape: f32[2,8,32], index: 0, kind: input, shape index: {}]   ;;  %s4773_s1 = inlined_call_operand.vmem [shape: f32[2,1,1,8], index: 1, kind: input, shape index: {}]   ;;  %s4774_s2 = inlined_call_operand.hbm [shape: f32[32,96], index: 2, kind: input, shape index: {}]   ;;  %s4775_s3 = inlined_call_operand.vmem [shape: f32[1,96], index: 3, kind: input, shape index: {}]   ;;  %s4776_s4 = inlined_call_operand.vmem [shape: f32[1,8], index: 4, kind: input, shape index: {}]   ;;  %s4777_s5 = inlined_call_operand.vmem [shape: f32[1,8], index: 5, kind: input, shape index: {}]   ;;  %s4778_s6 = inlined_call_operand.vmem [shape: f32[1,8], index: 6, kind: input, shape index: {}]   ;;  %s4779_s7 = inlined_call_operand.vmem [shape: f32[1,8], index: 7, kind: input, shape index: {}]   ;;  %s4780_s8 = inlined_call_operand.hbm [shape: f32[2,8,32], index: 8, kind: output, shape index: {0}]   ;;  %s4781_s9 = inlined_call_operand.hbm [shape: f32[2,8,32], index: 9, kind: output, shape index: {1}]   ;;  %s4782_s10 = inlined_call_operand.hbm [shape: f32[2,8,32], index: 10, kind: output, shape index: {2}]  }
   0x1   :  { %17 = vsyncpa [#allocation6], 0 }
   0x2   :  { %18 = vsyncpa [#allocation4], 0 }
   0x3   :  { %19 = vsyncpa [#allocation9], 0  ;;  %s3671_s13 = smov [#allocation2]   ;;  %s3553_s17 = scalar_lea.hbm %s4772_s0, 256 }
   0x4   :  { %s25_s14 = sshll.u32 %s3671_s13, 4  ;;  %p3554_p0 = scmp.ne.s32.totalorder %s4772_s0, %s3553_s17  ;;  %s26_s14 = int_to_ptr.vmem [resolvable:$true] %s25_s14 }
   0x5   :  { %p3557_p1 = scmp.lt.u32.totalorder %s3553_s17, %s4772_s0 }
   0x7   :  { %p3559_p2 = pnand %p3557_p1, %p3554_p0 }
   0x9   :  { %3562 = shalt.err (!%p3559_p2)
}
   0xa   :  { %s3563_s22 = scalar_lea.vmem %s26_s14, 256  ;;  %p3568_p4 = scmp.lt.s32.totalorder %s26_s14, %s26_s14 }
   0xb   :  { %p3564_p3 = scmp.ne.s32.totalorder %s26_s14, %s3563_s22  ;;  %p3569_p5 = scmp.lt.s32.totalorder %s3563_s22, %s3563_s22 }
   0xd   :  { %p3570_p6 = por %p3569_p5, %p3568_p4 }
   0xf   :  { %p3571_p7 = pnand %p3570_p6, %p3564_p3 }
  0x11   :  { %3574 = shalt.err (!%p3571_p7)
}
  0x12   :  { %s3672_s23 = smov 128   ;;  %s3673_s24 = smov 8  }
  0x13   :  { %31 = dma.hbm_to_vmem [thread:$0]  %s4772_s0, 256, %s26_s14, [#allocation3], %s3672_s23, %s3672_s23, %s3673_s24  }
  0x14   :  { %s3674_s27 = smov [#allocation5]   ;;  %s3575_s11 = scalar_lea.hbm %s4774_s2, 512 }
  0x15   :  { %s39_s28 = sshll.u32 %s3674_s27, 4  ;;  %p3576_p8 = scmp.ne.s32.totalorder %s4774_s2, %s3575_s11  ;;  %s40_s28 = int_to_ptr.vmem [resolvable:$true] %s39_s28 }
  0x16   :  { %p3579_p9 = scmp.lt.u32.totalorder %s3575_s11, %s4774_s2 }
  0x18   :  { %p3581_p10 = pnand %p3579_p9, %p3576_p8 }
  0x1a   :  { %3584 = shalt.err (!%p3581_p10)
}
  0x1b   :  { %s3585_s17 = scalar_lea.vmem %s40_s28, 512  ;;  %p3590_p12 = scmp.lt.s32.totalorder %s40_s28, %s40_s28 }
  0x1c   :  { %p3586_p11 = scmp.ne.s32.totalorder %s40_s28, %s3585_s17  ;;  %p3591_p13 = scmp.lt.s32.totalorder %s3585_s17, %s3585_s17 }
  0x1e   :  { %p3592_p0 = por %p3591_p13, %p3590_p12 }
  0x20   :  { %p3593_p1 = pnand %p3592_p0, %p3586_p11 }
  0x22   :  { %3596 = shalt.err (!%p3593_p1)
}
  0x23   :  { %45 = dma.hbm_to_vmem [thread:$0]  %s4774_s2, 512, %s40_s28, [#allocation6], %s3672_s23, %s3672_s23, %s3673_s24  }
  0x24   :  { %3663 = dma.done.wait [#allocation3], 256  }
  0x25   :  { %3664 = vsyncadd [#allocation3], 4294967040 }
  0x26   :  { %3665 = dma.done.wait [#allocation6], 512  }
  0x27   :  { %3666 = vsyncadd [#allocation6], 4294966784  ;;  %vm75_vm0 = vcmask 261120   ;;  %v64_v0 = vld [vmem:[#allocation5] sm:$0xff]  ;;  %v65_v1 = vld [vmem:[#allocation5 + $0x8] sm:$0xff]  ;;  %s3675_s19 = smov 104   ;;  %v192_v22 = vlaneseq }
  0x28   :  { %v66_v2 = vld [vmem:[#allocation5 + $0x10] sm:$0xff]  ;;  %v3431_v3 = vpack.c.bf16 %v65_v1, %v64_v0  ;;  %v67_v4 = vld [vmem:[#allocation5 + $0x18] sm:$0xff]  ;;  %s3676_s20 = smov 120   ;;  %v4783_v12 = vmov 0.0   ;;  %s3679_s21 = smov 96   ;;  %vm323_vm1 = vcmask 60416  }
  0x29   :  { %v62_v5 = vld [vmem:[#allocation2] sm:$0xff]  ;;  %v3435_v6 = vpack.c.bf16 %v67_v4, %v66_v2  ;;  %v63_v7 = vld [vmem:[#allocation2 + $0x8] sm:$0xff]  ;;  %3351 = vmatprep.subr.mxu1 %v4783_v12  ;;  %v3680_v20 = vmov 1983009808   ;;  %v193_v24 = vshrl.u32 %v192_v22, 7  ;;  %s3682_s22 = smov 64  }
  0x2a   :  { %3348 = vmatprep.mubr.msk.f32.mxu0 %vm75_vm0, %v62_v5  ;;  %3432 = vmatprep.subr.bf16.mxu0 %v3431_v3  ;;  %v3261_v8 = vld [vmem:[%s4775_s3] ss:$0 sm:$0xff]  ;;  %s3678_s3 = smov 112   ;;  %v190_v21 = vunpack.c.l.s4 %v3680_v20  ;;  %v3681_v26 = vmov 1934713408   ;;  %vm3683_vm2 = vmmov 0  }
  0x2b   :  { %3434 = vmatpush3.bf16.msra.mxu0 %v3431_v3  ;;  %v222_v27 = vunpack.c.l.s4 %v3681_v26  ;;  %3353 = vmatprep.mubr.msk.f32.mxu1 %vm3683_vm2, %v4783_v12  ;;  %vm1151_vm3 = vcmask 64512   ;;  %s3685_s13 = smov 24   ;;  %vm1154_vm4 = vcmask 130048   ;;  %vm1157_vm5 = vcmask 195584   ;;  %s3686_s15 = smov [#allocation8]  }
  0x2c   :  { %3436 = vmatprep.subr.bf16.mxu0 %v3435_v6  ;;  %v191_v23 = vunpack.c.0.s8 %v190_v21  ;;  %s3229_s16 = sshll.u32 %s3686_s15, 4  ;;  %s3230_s16 = int_to_ptr.vmem [resolvable:$true] %s3229_s16 }
  0x2d   :  { %v223_v31 = vunpack.c.0.s8 %v222_v27  ;;  %s3597_s17 = scalar_lea.vmem %s3230_s16, 256  ;;  %p3602_p3 = scmp.lt.s32.totalorder %s3230_s16, %s3230_s16 }
  0x2e   :  { %v3813_v28 = vsub.s32 %v191_v23, %v193_v24  ;;  %p3598_p2 = scmp.ne.s32.totalorder %s3230_s16, %s3597_s17  ;;  %p3603_p4 = scmp.lt.s32.totalorder %s3597_s17, %s3597_s17 }
  0x2f   :  { %3438 = vmatpush3.bf16.msra.mxu0 %v3435_v6  ;;  %v3821_v35 = vsub.s32 %v223_v31, %v193_v24 }
  0x30   :  { %3361 = vmatprep.subr.mxu0 %v4783_v12  ;;  %p3604_p5 = por %p3603_p4, %p3602_p3 }
  0x32   :  { %3349 = vmatmul.mubr.msk.f32.vlgmr.msra.gmra.mrb[0].mxu0 %vm75_vm0, %v63_v7  ;;  %p3605_p6 = pnand %p3604_p5, %p3598_p2 }
  0x33   :  { %3363 = vmatprep.mubr.msk.f32.mxu0 %vm3683_vm2, %v4783_v12 }
 0x105   :  { %v3350_v9 = vpop.f32.mrb[0].mxu0 }
 0x106   :  { %v148_v10 = vpop.f32.mrb[1].mxu0  ;;  %v3785_v13 = vadd.f32 %v3350_v9, %v3261_v8 }
 0x107   :  { %v3779_v11 = vadd.f32 %v3261_v8, %v148_v10 }
 0x109   :  { %181 = vrot.lane.b32.xlu1 %v3779_v11, %s3675_s19  ;;  %169 = vrot.lane.b32.xlu0 %v3779_v11, %s3676_s20 }
 0x10d   :  { %171 = vrot.lane.b32.xlu1 %v3785_v13, %s3676_s20  ;;  %175 = vrot.lane.b32.xlu0 %v3779_v11, %s3678_s3 }
 0x111   :  { %183 = vrot.lane.b32.xlu1 %v3785_v13, %s3675_s19  ;;  %177 = vrot.lane.b32.xlu0 %v3785_v13, %s3678_s3 }
 0x115   :  { %579 = vrot.lane.b32.xlu0 %v3779_v11, %s3679_s21 }
 0x17b   :  { %v3792_v14 = vpop.permute.xlu1 %181  ;;  %v3794_v15 = vpop.permute.xlu0 %169 }
 0x17c   :  { %583 = vrot.lane.b32.xlu1 %v3794_v15, %s3679_s21  ;;  %v203_v29 = vcombine.low %v3794_v15, %v3792_v14  ;;  %v204_v36 = vcombine.high %v3794_v15, %v3792_v14 }
 0x17e   :  { %v211_v32 = vrot.slane %v203_v29, %v3813_v28  ;;  %v218_v40 = vrot.slane %v204_v36, %v3813_v28 }
 0x17f   :  { %v3797_v16 = vpop.permute.xlu0 %175  ;;  %v3801_v17 = vpop.permute.xlu1 %171 }
 0x180   :  { %591 = vrot.lane.b32.xlu1 %v3792_v14, %s3679_s21  ;;  %587 = vrot.lane.b32.xlu0 %v3797_v16, %s3679_s21  ;;  %v187_v25 = vcombine.low %v3779_v11, %v3797_v16  ;;  %v188_v33 = vcombine.high %v3779_v11, %v3797_v16 }
 0x182   :  { %v195_v30 = vrot.slane %v187_v25, %v3813_v28  ;;  %v202_v37 = vrot.slane %v188_v33, %v3813_v28 }
 0x183   :  { %v3805_v18 = vpop.permute.xlu1 %183  ;;  %v3807_v19 = vpop.permute.xlu0 %177 }
 0x184   :  { %585 = vrot.lane.b32.xlu1 %v3801_v17, %s3679_s21  ;;  %581 = vrot.lane.b32.xlu0 %v3785_v13, %s3679_s21  ;;  %4787 = vst [vmem:[#allocation15_spill] sm:$0xff] %v3805_v18  ;;  %4788 = vst [vmem:[#allocation16_spill] sm:$0xff] %v3807_v19  ;;  %v219_v34 = vcombine.low %v195_v30, %v211_v32  ;;  %v220_v39 = vcombine.high %v195_v30, %v211_v32 }
 0x185   :  { %v235_v43 = vcombine.low %v202_v37, %v218_v40  ;;  %v236_v47 = vcombine.high %v202_v37, %v218_v40 }
 0x186   :  { %v3827_v38 = vrot.slane %v219_v34, %v3821_v35  ;;  %v3835_v42 = vrot.slane %v220_v39, %v3821_v35 }
 0x187   :  { %v3844_v46 = vrot.slane %v235_v43, %v3821_v35  ;;  %v3855_v51 = vrot.slane %v236_v47, %v3821_v35  ;;  %v580_v58 = vpop.permute.xlu0 %579 }
 0x188   :  { %593 = vrot.lane.b32.xlu1 %v3805_v18, %s3679_s21  ;;  %589 = vrot.lane.b32.xlu0 %v3807_v19, %s3679_s21  ;;  %v3832_v41 = vcombine.high %v3827_v38, %v4783_v12  ;;  %v3841_v45 = vcombine.high %v3835_v42, %v4783_v12  ;;  %v324_v49 = vsel %vm323_vm1, %v3827_v38, 0.0  ;;  %v330_v53 = vsel %vm323_vm1, %v3835_v42, 0.0 }
 0x189   :  { %v3852_v50 = vcombine.high %v3844_v46, %v4783_v12  ;;  %v3863_v54 = vcombine.high %v3855_v51, %v4783_v12  ;;  %v336_v56 = vsel %vm323_vm1, %v3844_v46, 0.0  ;;  %v342_v57 = vsel %vm323_vm1, %v3855_v51, 0.0 }
 0x18a   :  { %v327_v44 = vsel %vm323_vm1, %v3832_v41, 0.0  ;;  %v333_v48 = vsel %vm323_vm1, %v3841_v45, 0.0 }
 0x18b   :  { %v339_v52 = vsel %vm323_vm1, %v3852_v50, 0.0  ;;  %v345_v55 = vsel %vm323_vm1, %v3863_v54, 0.0 }
 0x1a7   :  { %328 = vadd.xlane.f32.xlu0 %v327_v44 }
 0x1ab   :  { %334 = vadd.xlane.f32.xlu0 %v333_v48 }
 0x1ac   :  { %325 = vadd.xlane.f32.xlu1 %v324_v49 }
 0x1af   :  { %340 = vadd.xlane.f32.xlu0 %v339_v52 }
 0x1b0   :  { %331 = vadd.xlane.f32.xlu1 %v330_v53 }
 0x1b3   :  { %346 = vadd.xlane.f32.xlu0 %v345_v55 }
 0x1b4   :  { %337 = vadd.xlane.f32.xlu1 %v336_v56 }
 0x1b8   :  { %343 = vadd.xlane.f32.xlu1 %v342_v57 }
 0x1ee   :  { %v584_v59 = vpop.permute.xlu1 %583 }
 0x1f2   :  { %v592_v60 = vpop.permute.xlu1 %591  ;;  %v588_v61 = vpop.permute.xlu0 %587 }
 0x1f3   :  { %v619_v62 = vcombine.low %v584_v59, %v592_v60  ;;  %v603_v63 = vcombine.low %v580_v58, %v588_v61  ;;  %v620_v36 = vcombine.high %v584_v59, %v592_v60  ;;  %v604_v37 = vcombine.high %v580_v58, %v588_v61 }
 0x1f4   :  { %v271_v60 = vcombine.low %v3801_v17, %v3805_v18  ;;  %v255_v61 = vcombine.low %v3785_v13, %v3807_v19 }
 0x1f5   :  { %v627_v0 = vrot.slane %v619_v62, %v3813_v28  ;;  %v611_v1 = vrot.slane %v603_v63, %v3813_v28  ;;  %v634_v49 = vrot.slane %v620_v36, %v3813_v28  ;;  %v618_v52 = vrot.slane %v604_v37, %v3813_v28 }
 0x1f6   :  { %v586_v2 = vpop.permute.xlu1 %585  ;;  %v582_v3 = vpop.permute.xlu0 %581 }
 0x1f7   :  { %v635_v4 = vcombine.low %v611_v1, %v627_v0  ;;  %v636_v5 = vcombine.high %v611_v1, %v627_v0  ;;  %v651_v59 = vcombine.low %v618_v52, %v634_v49 }
 0x1f9   :  { %v3874_v6 = vrot.slane %v635_v4, %v3821_v35  ;;  %v3879_v21 = vrot.slane %v636_v5, %v3821_v35  ;;  %v3936_v1 = vrot.slane %v651_v59, %v3821_v35  ;;  %v263_v5 = vrot.slane %v255_v61, %v3813_v28 }
 0x1fa   :  { %v594_v7 = vpop.permute.xlu1 %593  ;;  %v590_v10 = vpop.permute.xlu0 %589 }
 0x1fb   :  { %v687_v8 = vcombine.low %v586_v2, %v594_v7  ;;  %v688_v9 = vcombine.high %v586_v2, %v594_v7  ;;  %v739_v20 = vsel %vm323_vm1, %v3874_v6, 0.0  ;;  %v671_v22 = vcombine.low %v582_v3, %v590_v10 }
 0x1fc   :  { %v672_v23 = vcombine.high %v582_v3, %v590_v10  ;;  %740 = vadd.xlane.f32.xlu0 %v739_v20  ;;  %v745_v29 = vsel %vm323_vm1, %v3879_v21, 0.0  ;;  %v652_v2 = vcombine.high %v618_v52, %v634_v49  ;;  %v3942_v4 = vcombine.high %v3879_v21, %v4783_v12 }
 0x1fd   :  { %v695_v24 = vrot.slane %v687_v8, %v3813_v28  ;;  %v702_v25 = vrot.slane %v688_v9, %v3813_v28  ;;  %v679_v26 = vrot.slane %v671_v22, %v3813_v28  ;;  %v279_v7 = vrot.slane %v271_v60, %v3813_v28 }
 0x1fe   :  { %v686_v27 = vrot.slane %v672_v23, %v3813_v28  ;;  %v751_v8 = vsel %vm323_vm1, %v3936_v1, 0.0  ;;  %v3949_v9 = vrot.slane %v652_v2, %v3821_v35  ;;  %v272_v10 = vcombine.high %v3801_v17, %v3805_v18 }
 0x1ff   :  { %v703_v30 = vcombine.low %v679_v26, %v695_v24  ;;  %v704_v31 = vcombine.high %v679_v26, %v695_v24  ;;  %v256_v20 = vcombine.high %v3785_v13, %v3807_v19  ;;  %v748_v22 = vsel %vm323_vm1, %v3942_v4, 0.0 }
 0x200   :  { %746 = vadd.xlane.f32.xlu0 %v745_v29  ;;  %v719_v34 = vcombine.low %v686_v27, %v702_v25  ;;  %v720_v48 = vcombine.high %v686_v27, %v702_v25  ;;  %v3959_v23 = vcombine.high %v3936_v1, %v4783_v12  ;;  %v287_v24 = vcombine.low %v263_v5, %v279_v7 }
 0x201   :  { %v3888_v32 = vrot.slane %v703_v30, %v3821_v35  ;;  %v3891_v33 = vrot.slane %v704_v31, %v3821_v35  ;;  %v757_v25 = vsel %vm323_vm1, %v3949_v9, 0.0  ;;  %v3965_v26 = vcombine.high %v3874_v6, %v4783_v12 }
 0x202   :  { %v3906_v47 = vrot.slane %v719_v34, %v3821_v35  ;;  %v3919_v57 = vrot.slane %v720_v48, %v3821_v35  ;;  %v270_v27 = vrot.slane %v256_v20, %v3813_v28  ;;  %v286_v29 = vrot.slane %v272_v10, %v3813_v28 }
 0x203   :  { %v763_v39 = vsel %vm323_vm1, %v3888_v32, 0.0  ;;  %v3897_v40 = vcombine.high %v3888_v32, %v4783_v12  ;;  %v3903_v44 = vcombine.high %v3891_v33, %v4783_v12  ;;  %v769_v53 = vsel %vm323_vm1, %v3891_v33, 0.0 }
 0x204   :  { %764 = vadd.xlane.f32.xlu1 %v763_v39  ;;  %v3916_v56 = vcombine.high %v3906_v47, %v4783_v12  ;;  %v775_v58 = vsel %vm323_vm1, %v3906_v47, 0.0  ;;  %v3931_v63 = vcombine.high %v3919_v57, %v4783_v12  ;;  %v781_v0 = vsel %vm323_vm1, %v3919_v57, 0.0 }
 0x205   :  { %v766_v43 = vsel %vm323_vm1, %v3897_v40, 0.0  ;;  %v772_v55 = vsel %vm323_vm1, %v3903_v44, 0.0  ;;  %v754_v30 = vsel %vm323_vm1, %v3959_v23, 0.0  ;;  %v3973_v31 = vcombine.high %v3949_v9, %v4783_v12 }
 0x206   :  { %767 = vadd.xlane.f32.xlu0 %v766_v43  ;;  %v778_v62 = vsel %vm323_vm1, %v3916_v56, 0.0  ;;  %v784_v3 = vsel %vm323_vm1, %v3931_v63, 0.0  ;;  %v3976_v34 = vrot.slane %v287_v24, %v3821_v35  ;;  %v288_v36 = vcombine.high %v263_v5, %v279_v7 }
 0x207   :  { %v742_v37 = vsel %vm323_vm1, %v3965_v26, 0.0  ;;  %v760_v39 = vsel %vm323_vm1, %v3973_v31, 0.0  ;;  %v303_v49 = vcombine.low %v270_v27, %v286_v29  ;;  %v304_v59 = vcombine.high %v270_v27, %v286_v29 }
 0x208   :  { %770 = vadd.xlane.f32.xlu1 %v769_v53  ;;  %v3984_v43 = vcombine.high %v3976_v34, %v4783_v12  ;;  %v3987_v48 = vrot.slane %v288_v36, %v3821_v35  ;;  %v348_v52 = vsel %vm323_vm1, %v3976_v34, 0.0 }
 0x20a   :  { %773 = vadd.xlane.f32.xlu0 %v772_v55  ;;  %v351_v53 = vsel %vm323_vm1, %v3984_v43, 0.0  ;;  %v3995_v55 = vcombine.high %v3987_v48, %v4783_v12  ;;  %v354_v60 = vsel %vm323_vm1, %v3987_v48, 0.0 }
 0x20c   :  { %776 = vadd.xlane.f32.xlu1 %v775_v58  ;;  %v3998_v58 = vrot.slane %v303_v49, %v3821_v35  ;;  %v357_v61 = vsel %vm323_vm1, %v3995_v55, 0.0 }
 0x20e   :  { %779 = vadd.xlane.f32.xlu0 %v778_v62  ;;  %v4006_v62 = vcombine.high %v3998_v58, %v4783_v12  ;;  %v360_v2 = vsel %vm323_vm1, %v3998_v58, 0.0 }
 0x210   :  { %782 = vadd.xlane.f32.xlu1 %v781_v0  ;;  %v4009_v0 = vrot.slane %v304_v59, %v3821_v35 }
 0x212   :  { %785 = vadd.xlane.f32.xlu0 %v784_v3  ;;  %v363_v3 = vsel %vm323_vm1, %v4006_v62, 0.0  ;;  %v4017_v5 = vcombine.high %v4009_v0, %v4783_v12  ;;  %v366_v7 = vsel %vm323_vm1, %v4009_v0, 0.0 }
 0x214   :  { %752 = vadd.xlane.f32.xlu1 %v751_v8  ;;  %v369_v8 = vsel %vm323_vm1, %v4017_v5, 0.0 }
 0x216   :  { %749 = vadd.xlane.f32.xlu0 %v748_v22 }
 0x218   :  { %758 = vadd.xlane.f32.xlu1 %v757_v25 }
 0x21a   :  { %755 = vadd.xlane.f32.xlu0 %v754_v30 }
 0x21c   :  { %743 = vadd.xlane.f32.xlu1 %v742_v37 }
 0x21e   :  { %761 = vadd.xlane.f32.xlu0 %v760_v39 }
 0x220   :  { %349 = vadd.xlane.f32.xlu1 %v348_v52 }
 0x222   :  { %352 = vadd.xlane.f32.xlu0 %v351_v53 }
 0x224   :  { %355 = vadd.xlane.f32.xlu1 %v354_v60 }
 0x226   :  { %358 = vadd.xlane.f32.xlu0 %v357_v61 }
 0x228   :  { %361 = vadd.xlane.f32.xlu1 %v360_v2 }
 0x22a   :  { %364 = vadd.xlane.f32.xlu0 %v363_v3 }
 0x22c   :  { %367 = vadd.xlane.f32.xlu1 %v366_v7 }
 0x22e   :  { %370 = vadd.xlane.f32.xlu0 %v369_v8 }
 0x234   :  { %v329_v10 = vpop.xlane.xlu0 %328 }
 0x235   :  { %v374_v20 = vmul.f32 0.125, %v329_v10 }
 0x237   :  { %v4024_v22 = vsub.f32 %v3832_v41, %v374_v20 }
 0x238   :  { %v335_v24 = vpop.xlane.xlu0 %334 }
 0x239   :  { %v326_v25 = vpop.xlane.xlu1 %325  ;;  %v376_v27 = vmul.f32 0.125, %v335_v24  ;;  %v406_v30 = vmul.f32 %v4024_v22, %v4024_v22 }
 0x23a   :  { %v373_v29 = vmul.f32 0.125, %v326_v25 }
 0x23b   :  { %v4029_v36 = vsub.f32 %v3841_v45, %v376_v27  ;;  %v424_v39 = vsel %vm323_vm1, %v406_v30, 0.0 }
 0x23c   :  { %v4032_v37 = vsub.f32 %v3827_v38, %v373_v29  ;;  %425 = vadd.xlane.f32.xlu0 %v424_v39  ;;  %v341_v49 = vpop.xlane.xlu0 %340 }
 0x23d   :  { %v332_v52 = vpop.xlane.xlu1 %331  ;;  %v378_v41 = vmul.f32 0.125, %v341_v49  ;;  %v408_v59 = vmul.f32 %v4029_v36, %v4029_v36 }
 0x23e   :  { %v375_v53 = vmul.f32 0.125, %v332_v52  ;;  %v405_v60 = vmul.f32 %v4032_v37, %v4032_v37 }
 0x23f   :  { %v4040_v61 = vsub.f32 %v3852_v50, %v378_v41  ;;  %v430_v38 = vsel %vm323_vm1, %v408_v59, 0.0 }
 0x240   :  { %v4043_v45 = vsub.f32 %v3835_v42, %v375_v53  ;;  %v421_v2 = vsel %vm323_vm1, %v405_v60, 0.0  ;;  %431 = vadd.xlane.f32.xlu0 %v430_v38  ;;  %v347_v3 = vpop.xlane.xlu0 %346 }
 0x241   :  { %v338_v7 = vpop.xlane.xlu1 %337  ;;  %422 = vadd.xlane.f32.xlu1 %v421_v2  ;;  %v380_v8 = vmul.f32 0.125, %v347_v3  ;;  %v410_v20 = vmul.f32 %v4040_v61, %v4040_v61 }
 0x242   :  { %v377_v10 = vmul.f32 0.125, %v338_v7  ;;  %v407_v50 = vmul.f32 %v4043_v45, %v4043_v45 }
 0x243   :  { %v4052_v24 = vsub.f32 %v3863_v54, %v380_v8  ;;  %v436_v25 = vsel %vm323_vm1, %v410_v20, 0.0 }
 0x244   :  { %v4055_v42 = vsub.f32 %v3844_v46, %v377_v10  ;;  %v427_v27 = vsel %vm323_vm1, %v407_v50, 0.0  ;;  %437 = vadd.xlane.f32.xlu0 %v436_v25 }
 0x245   :  { %v344_v29 = vpop.xlane.xlu1 %343  ;;  %428 = vadd.xlane.f32.xlu1 %v427_v27  ;;  %v412_v39 = vmul.f32 %v4052_v24, %v4052_v24 }
 0x246   :  { %v379_v30 = vmul.f32 0.125, %v344_v29  ;;  %v409_v49 = vmul.f32 %v4055_v42, %v4055_v42 }
 0x247   :  { %v442_v46 = vsel %vm323_vm1, %v412_v39, 0.0 }
 0x248   :  { %v4064_v54 = vsub.f32 %v3855_v51, %v379_v30  ;;  %v433_v52 = vsel %vm323_vm1, %v409_v49, 0.0  ;;  %443 = vadd.xlane.f32.xlu0 %v442_v46 }
 0x249   :  { %434 = vadd.xlane.f32.xlu1 %v433_v52 }
 0x24a   :  { %v411_v41 = vmul.f32 %v4064_v54, %v4064_v54 }
 0x24c   :  { %v439_v53 = vsel %vm323_vm1, %v411_v41, 0.0 }
 0x24d   :  { %440 = vadd.xlane.f32.xlu1 %v439_v53 }
 0x289   :  { %v741_v59 = vpop.xlane.xlu0 %740 }
 0x28a   :  { %v787_v41 = vmul.f32 0.125, %v741_v59 }
 0x28d   :  { %v747_v60 = vpop.xlane.xlu0 %746 }
 0x291   :  { %v765_v38 = vpop.xlane.xlu1 %764 }
 0x292   :  { %v795_v2 = vmul.f32 0.125, %v765_v38 }
 0x293   :  { %v768_v3 = vpop.xlane.xlu0 %767 }
 0x294   :  { %v4072_v51 = vsub.f32 %v3888_v32, %v795_v2  ;;  %v796_v7 = vmul.f32 0.125, %v768_v3 }
 0x295   :  { %v771_v8 = vpop.xlane.xlu1 %770 }
 0x296   :  { %v4075_v10 = vsub.f32 %v3897_v40, %v796_v7  ;;  %v797_v20 = vmul.f32 0.125, %v771_v8  ;;  %v827_v50 = vmul.f32 %v4072_v51, %v4072_v51 }
 0x297   :  { %v774_v25 = vpop.xlane.xlu0 %773 }
 0x298   :  { %v4080_v27 = vsub.f32 %v3891_v33, %v797_v20  ;;  %v798_v29 = vmul.f32 0.125, %v774_v25  ;;  %v859_v30 = vsel %vm323_vm1, %v827_v50, 0.0  ;;  %v828_v32 = vmul.f32 %v4075_v10, %v4075_v10 }
 0x299   :  { %860 = vadd.xlane.f32.xlu1 %v859_v30  ;;  %v777_v39 = vpop.xlane.xlu1 %776  ;;  %v789_v50 = vmul.f32 0.125, %v747_v60 }
 0x29a   :  { %v4086_v49 = vsub.f32 %v3903_v44, %v798_v29  ;;  %v799_v40 = vmul.f32 0.125, %v777_v39  ;;  %v862_v46 = vsel %vm323_vm1, %v828_v32, 0.0  ;;  %v829_v52 = vmul.f32 %v4080_v27, %v4080_v27 }
 0x29b   :  { %863 = vadd.xlane.f32.xlu0 %v862_v46  ;;  %v780_v33 = vpop.xlane.xlu0 %779 }
 0x29c   :  { %v4092_v53 = vsub.f32 %v3906_v47, %v799_v40  ;;  %v800_v38 = vmul.f32 0.125, %v780_v33  ;;  %v865_v2 = vsel %vm323_vm1, %v829_v52, 0.0  ;;  %v830_v3 = vmul.f32 %v4086_v49, %v4086_v49 }
 0x29d   :  { %866 = vadd.xlane.f32.xlu1 %v865_v2  ;;  %v783_v44 = vpop.xlane.xlu1 %782  ;;  %v4104_v47 = vsub.f32 %v3874_v6, %v787_v41  ;;  %v4119_v52 = vsub.f32 %v3879_v21, %v789_v50 }
 0x29e   :  { %v4098_v7 = vsub.f32 %v3916_v56, %v800_v38  ;;  %v801_v8 = vmul.f32 0.125, %v783_v44  ;;  %v868_v20 = vsel %vm323_vm1, %v830_v3, 0.0  ;;  %v831_v59 = vmul.f32 %v4092_v53, %v4092_v53 }
 0x29f   :  { %869 = vadd.xlane.f32.xlu0 %v868_v20  ;;  %v786_v25 = vpop.xlane.xlu0 %785 }
 0x2a0   :  { %v4107_v29 = vsub.f32 %v3919_v57, %v801_v8  ;;  %v802_v30 = vmul.f32 0.125, %v786_v25  ;;  %v871_v32 = vsel %vm323_vm1, %v831_v59, 0.0  ;;  %v832_v56 = vmul.f32 %v4098_v7, %v4098_v7 }
 0x2a1   :  { %872 = vadd.xlane.f32.xlu1 %v871_v32  ;;  %v753_v39 = vpop.xlane.xlu1 %752  ;;  %v821_v59 = vmul.f32 %v4119_v52, %v4119_v52 }
 0x2a2   :  { %v4113_v40 = vsub.f32 %v3931_v63, %v802_v30  ;;  %v874_v6 = vsel %vm323_vm1, %v832_v56, 0.0  ;;  %v833_v60 = vmul.f32 %v4107_v29, %v4107_v29  ;;  %v791_v46 = vmul.f32 0.125, %v753_v39 }
 0x2a3   :  { %875 = vadd.xlane.f32.xlu0 %v874_v6  ;;  %v750_v57 = vpop.xlane.xlu0 %749  ;;  %v819_v63 = vmul.f32 %v4104_v47, %v4104_v47 }
 0x2a4   :  { %v877_v41 = vsel %vm323_vm1, %v833_v60, 0.0  ;;  %v834_v33 = vmul.f32 %v4113_v40, %v4113_v40  ;;  %v4128_v3 = vsub.f32 %v3936_v1, %v791_v46  ;;  %v790_v44 = vmul.f32 0.125, %v750_v57 }
 0x2a5   :  { %878 = vadd.xlane.f32.xlu1 %v877_v41  ;;  %v759_v38 = vpop.xlane.xlu1 %758  ;;  %v835_v20 = vsel %vm323_vm1, %v819_v63, 0.0  ;;  %v841_v60 = vsel %vm323_vm1, %v821_v59, 0.0 }
 0x2a6   :  { %v880_v2 = vsel %vm323_vm1, %v834_v33, 0.0  ;;  %v793_v21 = vmul.f32 0.125, %v759_v38  ;;  %v4134_v30 = vsub.f32 %v3942_v4, %v790_v44  ;;  %v823_v1 = vmul.f32 %v4128_v3, %v4128_v3 }
 0x2a7   :  { %881 = vadd.xlane.f32.xlu0 %v880_v2  ;;  %v756_v8 = vpop.xlane.xlu0 %755 }
 0x2a8   :  { %v4139_v56 = vsub.f32 %v3949_v9, %v793_v21  ;;  %v792_v39 = vmul.f32 0.125, %v756_v8  ;;  %v847_v63 = vsel %vm323_vm1, %v823_v1, 0.0  ;;  %v822_v9 = vmul.f32 %v4134_v30, %v4134_v30 }
 0x2a9   :  { %v744_v50 = vpop.xlane.xlu1 %743  ;;  %836 = vadd.xlane.f32.xlu1 %v835_v20 }
 0x2aa   :  { %v788_v25 = vmul.f32 0.125, %v744_v50  ;;  %v4151_v38 = vsub.f32 %v3959_v23, %v792_v39  ;;  %v825_v44 = vmul.f32 %v4139_v56, %v4139_v56  ;;  %v844_v23 = vsel %vm323_vm1, %v822_v9, 0.0 }
 0x2ab   :  { %v762_v32 = vpop.xlane.xlu0 %761 }
 0x2ac   :  { %v4142_v6 = vsub.f32 %v3965_v26, %v788_v25  ;;  %v794_v41 = vmul.f32 0.125, %v762_v32  ;;  %v824_v1 = vmul.f32 %v4151_v38, %v4151_v38 }
 0x2ad   :  { %v350_v46 = vpop.xlane.xlu1 %349  ;;  %842 = vadd.xlane.f32.xlu1 %v841_v60 }
 0x2ae   :  { %v381_v57 = vmul.f32 0.125, %v350_v46  ;;  %v820_v4 = vmul.f32 %v4142_v6, %v4142_v6  ;;  %v4160_v20 = vsub.f32 %v3973_v31, %v794_v41 }
 0x2af   :  { %v353_v33 = vpop.xlane.xlu0 %352 }
 0x2b0   :  { %v4154_v26 = vsub.f32 %v3976_v34, %v381_v57  ;;  %v838_v2 = vsel %vm323_vm1, %v820_v4, 0.0  ;;  %v382_v59 = vmul.f32 0.125, %v353_v33  ;;  %v853_v34 = vsel %vm323_vm1, %v825_v44, 0.0 }
 0x2b1   :  { %v356_v8 = vpop.xlane.xlu1 %355  ;;  %848 = vadd.xlane.f32.xlu1 %v847_v63  ;;  %839 = vadd.xlane.f32.xlu0 %v838_v2  ;;  %v850_v33 = vsel %vm323_vm1, %v824_v1, 0.0 }
 0x2b2   :  { %v383_v21 = vmul.f32 0.125, %v356_v8  ;;  %v413_v32 = vmul.f32 %v4154_v26, %v4154_v26  ;;  %v4172_v60 = vsub.f32 %v3984_v43, %v382_v59 }
 0x2b3   :  { %v359_v50 = vpop.xlane.xlu0 %358 }
 0x2b4   :  { %v4164_v25 = vsub.f32 %v3987_v48, %v383_v21  ;;  %v384_v46 = vmul.f32 0.125, %v359_v50  ;;  %v826_v48 = vmul.f32 %v4160_v20, %v4160_v20  ;;  %v445_v41 = vsel %vm323_vm1, %v413_v32, 0.0 }
 0x2b5   :  { %v362_v39 = vpop.xlane.xlu1 %361  ;;  %854 = vadd.xlane.f32.xlu1 %v853_v34  ;;  %845 = vadd.xlane.f32.xlu0 %v844_v23 }
 0x2b6   :  { %v385_v31 = vmul.f32 0.125, %v362_v39  ;;  %v415_v63 = vmul.f32 %v4164_v25, %v4164_v25  ;;  %v4184_v2 = vsub.f32 %v3995_v55, %v384_v46  ;;  %v856_v44 = vsel %vm323_vm1, %v826_v48, 0.0 }
 0x2b7   :  { %v365_v57 = vpop.xlane.xlu0 %364 }
 0x2b8   :  { %v4177_v4 = vsub.f32 %v3998_v58, %v385_v31  ;;  %v414_v58 = vmul.f32 %v4172_v60, %v4172_v60  ;;  %v386_v8 = vmul.f32 0.125, %v365_v57  ;;  %v451_v59 = vsel %vm323_vm1, %v415_v63, 0.0 }
 0x2b9   :  { %v368_v9 = vpop.xlane.xlu1 %367  ;;  %446 = vadd.xlane.f32.xlu1 %v445_v41  ;;  %851 = vadd.xlane.f32.xlu0 %v850_v33  ;;  %v416_v34 = vmul.f32 %v4184_v2, %v4184_v2 }
 0x2ba   :  { %v387_v43 = vmul.f32 0.125, %v368_v9  ;;  %v417_v50 = vmul.f32 %v4177_v4, %v4177_v4  ;;  %v448_v55 = vsel %vm323_vm1, %v414_v58, 0.0  ;;  %v4199_v32 = vsub.f32 %v4006_v62, %v386_v8 }
 0x2bb   :  { %v371_v23 = vpop.xlane.xlu0 %370  ;;  %v454_v57 = vsel %vm323_vm1, %v416_v34, 0.0 }
 0x2bc   :  { %v4190_v21 = vsub.f32 %v4009_v0, %v387_v43  ;;  %v388_v1 = vmul.f32 0.125, %v371_v23  ;;  %v457_v0 = vsel %vm323_vm1, %v417_v50, 0.0  ;;  %v418_v48 = vmul.f32 %v4199_v32, %v4199_v32 }
 0x2bd   :  { %452 = vadd.xlane.f32.xlu1 %v451_v59  ;;  %857 = vadd.xlane.f32.xlu0 %v856_v44 }
 0x2be   :  { %v419_v39 = vmul.f32 %v4190_v21, %v4190_v21  ;;  %v4205_v31 = vsub.f32 %v4017_v5, %v388_v1  ;;  %v460_v62 = vsel %vm323_vm1, %v418_v48, 0.0 }
 0x2c0   :  { %v463_v46 = vsel %vm323_vm1, %v419_v39, 0.0  ;;  %v420_v41 = vmul.f32 %v4205_v31, %v4205_v31 }
 0x2c1   :  { %458 = vadd.xlane.f32.xlu1 %v457_v0  ;;  %449 = vadd.xlane.f32.xlu0 %v448_v55 }
 0x2c2   :  { %v466_v33 = vsel %vm323_vm1, %v420_v41, 0.0 }
 0x2c5   :  { %464 = vadd.xlane.f32.xlu1 %v463_v46  ;;  %455 = vadd.xlane.f32.xlu0 %v454_v57 }
 0x2c9   :  { %461 = vadd.xlane.f32.xlu0 %v460_v62  ;;  %v426_v63 = vpop.xlane.xlu0 %425 }
 0x2ca   :  { %v470_v8 = vmul.f32 0.125, %v426_v63 }
 0x2cc   :  { %v486_v55 = vadd.f32 1e-12, %v470_v8 }
 0x2cd   :  { %467 = vadd.xlane.f32.xlu0 %v466_v33  ;;  %v432_v43 = vpop.xlane.xlu0 %431 }
 0x2ce   :  { %v423_v5 = vpop.xlane.xlu1 %422  ;;  %v472_v59 = vmul.f32 0.125, %v432_v43  ;;  %3457 = vrsqrt.f32 %v486_v55 }
 0x2cf   :  { %v469_v1 = vmul.f32 0.125, %v423_v5 }
 0x2d1   :  { %v438_v58 = vpop.xlane.xlu0 %437  ;;  %v485_v62 = vadd.f32 1e-12, %v469_v1 }
 0x2d2   :  { %v429_v9 = vpop.xlane.xlu1 %428  ;;  %v474_v0 = vmul.f32 0.125, %v438_v58 }
 0x2d3   :  { %v471_v50 = vmul.f32 0.125, %v429_v9 }
 0x2d4   :  { %v490_v33 = vadd.f32 1e-12, %v474_v0 }
 0x2d5   :  { %v444_v34 = vpop.xlane.xlu0 %443  ;;  %v487_v39 = vadd.f32 1e-12, %v471_v50 }
 0x2d6   :  { %159 = vrot.lane.b32.xlu1 %v3779_v11, %s3682_s22  ;;  %v435_v44 = vpop.xlane.xlu1 %434  ;;  %v488_v11 = vadd.f32 1e-12, %v472_v59  ;;  %v476_v46 = vmul.f32 0.125, %v444_v34 }
 0x2d7   :  { %v473_v12 = vmul.f32 0.125, %v435_v44 }
 0x2d8   :  { %3459 = vrsqrt.f32 %v488_v11  ;;  %v492_v63 = vadd.f32 1e-12, %v476_v46 }
 0x2d9   :  { %3461 = vrsqrt.f32 %v487_v39  ;;  %v489_v59 = vadd.f32 1e-12, %v473_v12  ;;  %v4225_v12 = vld [vmem:[%s4776_s4] ss:$0 sm:$0xff] }
 0x2da   :  { %v441_v23 = vpop.xlane.xlu1 %440  ;;  %3463 = vrsqrt.f32 %v485_v62 }
 0x2db   :  { %v475_v48 = vmul.f32 0.125, %v441_v23  ;;  %3465 = vrsqrt.f32 %v490_v33  ;;  %v3458_v23 = vpop.eup %3457 }
 0x2dc   :  { %3467 = vrsqrt.f32 %v492_v63 }
 0x2dd   :  { %v491_v9 = vadd.f32 1e-12, %v475_v48  ;;  %v518_v48 = vmul.f32 %v3458_v23, %v4024_v22 }
 0x2df   :  { %3469 = vrsqrt.f32 %v491_v9  ;;  %v540_v23 = vmul.f32 %v4225_v12, %v518_v48 }
 0x2e0   :  { %3471 = vrsqrt.f32 %v489_v59 }
 0x2e2   :  { %v3460_v11 = vpop.eup %3459 }
 0x2e3   :  { %v3462_v44 = vpop.eup %3461 }
 0x2e4   :  { %v3464_v33 = vpop.eup %3463 }
 0x326   :  { %v861_v57 = vpop.xlane.xlu1 %860 }
 0x327   :  { %v891_v58 = vmul.f32 0.125, %v861_v57  ;;  %v520_v57 = vmul.f32 %v3460_v11, %v4029_v36  ;;  %v4234_v36 = vld [vmem:[%s4777_s5] ss:$0 sm:$0xff] }
 0x328   :  { %v864_v41 = vpop.xlane.xlu0 %863 }
 0x329   :  { %v892_v50 = vmul.f32 0.125, %v864_v41  ;;  %v907_v39 = vadd.f32 1e-12, %v891_v58  ;;  %v519_v41 = vmul.f32 %v3462_v44, %v4043_v45  ;;  %v542_v45 = vmul.f32 %v4225_v12, %v520_v57 }
 0x32a   :  { %v867_v43 = vpop.xlane.xlu1 %866 }
 0x32b   :  { %v893_v34 = vmul.f32 0.125, %v867_v43  ;;  %v908_v46 = vadd.f32 1e-12, %v892_v50  ;;  %3473 = vrsqrt.f32 %v907_v39  ;;  %v541_v11 = vmul.f32 %v4225_v12, %v519_v41 }
 0x32c   :  { %v870_v8 = vpop.xlane.xlu0 %869  ;;  %v564_v41 = vadd.f32 %v4234_v36, %v542_v45 }
 0x32d   :  { %v894_v1 = vmul.f32 0.125, %v870_v8  ;;  %v909_v62 = vadd.f32 1e-12, %v893_v34  ;;  %v3466_v8 = vpop.eup %3465  ;;  %3475 = vrsqrt.f32 %v908_v46  ;;  %v517_v34 = vmul.f32 %v3464_v33, %v4032_v37 }
 0x32e   :  { %v873_v5 = vpop.xlane.xlu1 %872  ;;  %v3468_v58 = vpop.eup %3467  ;;  %v522_v46 = vmul.f32 %v3466_v8, %v4040_v61  ;;  %v562_v33 = vadd.f32 %v4234_v36, %v540_v23 }
 0x32f   :  { %v910_v63 = vadd.f32 1e-12, %v894_v1  ;;  %v895_v59 = vmul.f32 0.125, %v873_v5  ;;  %v3470_v50 = vpop.eup %3469  ;;  %3477 = vrsqrt.f32 %v909_v62  ;;  %v524_v37 = vmul.f32 %v3468_v58, %v4052_v24 }
 0x330   :  { %v876_v55 = vpop.xlane.xlu0 %875  ;;  %v523_v48 = vmul.f32 %v3470_v50, %v4064_v54  ;;  %v544_v58 = vmul.f32 %v4225_v12, %v522_v46 }
 0x331   :  { %3479 = vrsqrt.f32 %v910_v63  ;;  %v896_v5 = vmul.f32 0.125, %v876_v55  ;;  %v911_v44 = vadd.f32 1e-12, %v895_v59  ;;  %v563_v55 = vadd.f32 %v4234_v36, %v541_v11 }
 0x332   :  { %v879_v0 = vpop.xlane.xlu1 %878 }
 0x333   :  { %v897_v22 = vmul.f32 0.125, %v879_v0  ;;  %v3472_v0 = vpop.eup %3471  ;;  %v912_v59 = vadd.f32 1e-12, %v896_v5  ;;  %3481 = vrsqrt.f32 %v911_v44  ;;  %v1170_v44 = vcombine.low %v562_v33, %v564_v41  ;;  %v4259_v41 = vld [vmem:[%s4778_s6] ss:$0 sm:$0xff] }
 0x334   :  { %v882_v43 = vpop.xlane.xlu0 %881  ;;  %v521_v63 = vmul.f32 %v3472_v0, %v4055_v42 }
 0x335   :  { %v898_v19 = vmul.f32 0.125, %v882_v43  ;;  %v913_v62 = vadd.f32 1e-12, %v897_v22  ;;  %v539_v43 = vmul.f32 %v4225_v12, %v517_v34  ;;  %v546_v22 = vmul.f32 %v4225_v12, %v524_v37 }
 0x336   :  { %v837_v9 = vpop.xlane.xlu1 %836  ;;  %v543_v45 = vmul.f32 %v4225_v12, %v521_v63 }
 0x337   :  { %v914_v57 = vadd.f32 1e-12, %v898_v19  ;;  %v883_v18 = vmul.f32 0.125, %v837_v9  ;;  %v545_v19 = vmul.f32 %v4225_v12, %v523_v48  ;;  %3483 = vrsqrt.f32 %v913_v62  ;;  %v3474_v9 = vpop.eup %3473 }
 0x338   :  { %v561_v50 = vadd.f32 %v4234_v36, %v539_v43  ;;  %v3476_v34 = vpop.eup %3475  ;;  %v568_v43 = vadd.f32 %v4234_v36, %v546_v22  ;;  %v565_v33 = vadd.f32 %v4234_v36, %v543_v45 }
 0x339   :  { %3485 = vrsqrt.f32 %v914_v57  ;;  %v899_v23 = vadd.f32 1e-12, %v883_v18  ;;  %v567_v18 = vadd.f32 %v4234_v36, %v545_v19  ;;  %v939_v57 = vmul.f32 %v3474_v9, %v4072_v51 }
 0x33a   :  { %v843_v1 = vpop.xlane.xlu1 %842  ;;  %3487 = vrsqrt.f32 %v912_v59  ;;  %v1162_v48 = vcombine.low %v561_v50, %v563_v55  ;;  %v940_v55 = vmul.f32 %v3476_v34, %v4075_v10  ;;  %v4269_v10 = vrot.slane %v1170_v44, %v3813_v28 }
 0x33b   :  { %v885_v39 = vmul.f32 0.125, %v843_v1  ;;  %v961_v9 = vmul.f32 %v4259_v41, %v939_v57 }
 0x33d   :  { %v901_v24 = vadd.f32 1e-12, %v885_v39  ;;  %v3478_v39 = vpop.eup %3477 }
 0x33e   :  { %v849_v1 = vpop.xlane.xlu1 %848  ;;  %v840_v61 = vpop.xlane.xlu0 %839 }
 0x33f   :  { %v887_v8 = vmul.f32 0.125, %v849_v1  ;;  %v884_v54 = vmul.f32 0.125, %v840_v61  ;;  %3489 = vrsqrt.f32 %v901_v24  ;;  %v3480_v62 = vpop.eup %3479  ;;  %v566_v1 = vadd.f32 %v4234_v36, %v544_v58 }
 0x340   :  { %v941_v61 = vmul.f32 %v3478_v39, %v4080_v27  ;;  %v4265_v58 = vrot.slane %v1162_v48, %v3813_v28  ;;  %v3482_v19 = vpop.eup %3481  ;;  %v1178_v27 = vcombine.low %v565_v33, %v567_v18 }
 0x341   :  { %v900_v42 = vadd.f32 1e-12, %v884_v54  ;;  %v903_v11 = vadd.f32 1e-12, %v887_v8  ;;  %v942_v54 = vmul.f32 %v3480_v62, %v4086_v49  ;;  %v1186_v22 = vcombine.low %v566_v1, %v568_v43  ;;  %v4274_v49 = vld [vmem:[%s4779_s7] ss:$0 sm:$0xff] }
 0x342   :  { %v855_v5 = vpop.xlane.xlu1 %854  ;;  %v846_v0 = vpop.xlane.xlu0 %845  ;;  %v963_v34 = vmul.f32 %v4259_v41, %v941_v61  ;;  %v943_v62 = vmul.f32 %v3482_v19, %v4092_v53  ;;  %v1195_v43 = vcombine.high %v4265_v58, %v4269_v10  ;;  %v4288_v57 = vadd.f32 %v4274_v49, %v961_v9 }
 0x343   :  { %v889_v46 = vmul.f32 0.125, %v855_v5  ;;  %v886_v37 = vmul.f32 0.125, %v846_v0  ;;  %3491 = vrsqrt.f32 %v900_v42  ;;  %v962_v42 = vmul.f32 %v4259_v41, %v940_v55 }
 0x344   :  { %3493 = vrsqrt.f32 %v899_v23  ;;  %v3484_v23 = vpop.eup %3483  ;;  %v964_v39 = vmul.f32 %v4259_v41, %v942_v54  ;;  %v4283_v1 = vrot.slane %v1186_v22, %v3813_v28  ;;  %v4292_v33 = vrot.slane %v1178_v27, %v3813_v28 }
 0x345   :  { %v905_v63 = vadd.f32 1e-12, %v889_v46  ;;  %v902_v59 = vadd.f32 1e-12, %v886_v37  ;;  %3495 = vrsqrt.f32 %v903_v11  ;;  %v3486_v0 = vpop.eup %3485  ;;  %v1194_v37 = vcombine.low %v4265_v58, %v4269_v10 }
 0x346   :  { %v447_v24 = vpop.xlane.xlu1 %446  ;;  %v852_v8 = vpop.xlane.xlu0 %851  ;;  %v4295_v53 = vadd.f32 %v4274_v49, %v962_v42  ;;  %v4298_v61 = vadd.f32 %v4274_v49, %v963_v34  ;;  %v4302_v19 = vadd.f32 %v4274_v49, %v964_v39 }
 0x347   :  { %3497 = vrsqrt.f32 %v905_v63  ;;  %v888_v51 = vmul.f32 0.125, %v852_v8  ;;  %v477_v45 = vmul.f32 0.125, %v447_v24  ;;  %v3488_v48 = vpop.eup %3487  ;;  %v945_v63 = vmul.f32 %v3484_v23, %v4107_v29 }
 0x348   :  { %3499 = vrsqrt.f32 %v902_v59  ;;  %v946_v24 = vmul.f32 %v3486_v0, %v4113_v40  ;;  %v965_v23 = vmul.f32 %v4259_v41, %v943_v62  ;;  %v944_v40 = vmul.f32 %v3488_v48, %v4098_v7 }
 0x349   :  { %v904_v50 = vadd.f32 1e-12, %v888_v51  ;;  %v3490_v18 = vpop.eup %3489  ;;  %v493_v8 = vadd.f32 1e-12, %v477_v45  ;;  %v967_v45 = vmul.f32 %v4259_v41, %v945_v63 }
 0x34a   :  { %v453_v11 = vpop.xlane.xlu1 %452  ;;  %v858_v5 = vpop.xlane.xlu0 %857  ;;  %v933_v42 = vmul.f32 %v3490_v18, %v4119_v52 }
 0x34b   :  { %v479_v46 = vmul.f32 0.125, %v453_v11  ;;  %v890_v44 = vmul.f32 0.125, %v858_v5  ;;  %3501 = vrsqrt.f32 %v904_v50 }
 0x34c   :  { %v955_v7 = vmul.f32 %v4259_v41, %v933_v42 }
 0x34d   :  { %v906_v59 = vadd.f32 1e-12, %v890_v44  ;;  %v3492_v55 = vpop.eup %3491  ;;  %v495_v29 = vadd.f32 1e-12, %v479_v46  ;;  %v968_v46 = vmul.f32 %v4259_v41, %v946_v24 }
 0x34e   :  { %v459_v54 = vpop.xlane.xlu1 %458  ;;  %v450_v51 = vpop.xlane.xlu0 %449  ;;  %v932_v34 = vmul.f32 %v3492_v55, %v4142_v6  ;;  %v977_v42 = vadd.f32 %v4274_v49, %v955_v7  ;;  %v1210_v7 = vcombine.low %v4292_v33, %v4283_v1 }
 0x34f   :  { %v3494_v22 = vpop.eup %3493  ;;  %v481_v9 = vmul.f32 0.125, %v459_v54  ;;  %v478_v50 = vmul.f32 0.125, %v450_v51  ;;  %3503 = vrsqrt.f32 %v906_v59 }
 0x350   :  { %v3496_v27 = vpop.eup %3495  ;;  %v931_v44 = vmul.f32 %v3494_v22, %v4104_v47  ;;  %3505 = vrsqrt.f32 %v493_v8  ;;  %v954_v63 = vmul.f32 %v4259_v41, %v932_v34  ;;  %v1067_v8 = vcombine.low %v4295_v53, %v4302_v19 }
 0x351   :  { %v3498_v11 = vpop.eup %3497  ;;  %v497_v5 = vadd.f32 1e-12, %v481_v9  ;;  %v494_v0 = vadd.f32 1e-12, %v478_v50  ;;  %3507 = vrsqrt.f32 %v495_v29  ;;  %v935_v48 = vmul.f32 %v3496_v27, %v4128_v3 }
 0x352   :  { %v3500_v39 = vpop.eup %3499  ;;  %v937_v54 = vmul.f32 %v3498_v11, %v4139_v56  ;;  %v465_v62 = vpop.xlane.xlu1 %464  ;;  %v953_v51 = vmul.f32 %v4259_v41, %v931_v44  ;;  %v990_v53 = vadd.f32 %v4274_v49, %v968_v46  ;;  %v976_v19 = vadd.f32 %v4274_v49, %v954_v63 }
 0x353   :  { %v456_v52 = vpop.xlane.xlu0 %455  ;;  %v934_v6 = vmul.f32 %v3500_v39, %v4134_v30  ;;  %v483_v18 = vmul.f32 0.125, %v465_v62  ;;  %3509 = vrsqrt.f32 %v494_v0  ;;  %v966_v30 = vmul.f32 %v4259_v41, %v944_v40 }
 0x354   :  { %v480_v59 = vmul.f32 0.125, %v456_v52  ;;  %3511 = vrsqrt.f32 %v497_v5  ;;  %v959_v22 = vmul.f32 %v4259_v41, %v937_v54  ;;  %v987_v34 = vadd.f32 %v4274_v49, %v965_v23 }
 0x355   :  { %v956_v55 = vmul.f32 %v4259_v41, %v934_v6  ;;  %v499_v47 = vadd.f32 1e-12, %v483_v18  ;;  %v3502_v24 = vpop.eup %3501  ;;  %v989_v11 = vadd.f32 %v4274_v49, %v967_v45  ;;  %v988_v0 = vadd.f32 %v4274_v49, %v966_v30 }
 0x356   :  { %v496_v56 = vadd.f32 1e-12, %v480_v59  ;;  %v4322_v29 = vpop.permute.xlu1 %159  ;;  %v936_v9 = vmul.f32 %v3502_v24, %v4151_v38  ;;  %v957_v38 = vmul.f32 %v4259_v41, %v935_v48  ;;  %v975_v44 = vadd.f32 %v4274_v49, %v953_v51 }
 0x357   :  { %v462_v3 = vpop.xlane.xlu0 %461  ;;  %3513 = vrsqrt.f32 %v499_v47  ;;  %165 = vst.msk [vmem:[#allocation10] sm:$0xff] %vm75_vm0, %v4322_v29  ;;  %v978_v27 = vadd.f32 %v4274_v49, %v956_v55  ;;  %v981_v46 = vadd.f32 %v4274_v49, %v959_v22  ;;  %v1059_v45 = vcombine.low %v4288_v57, %v4298_v61 }
 0x358   :  { %v482_v50 = vmul.f32 0.125, %v462_v3  ;;  %3515 = vrsqrt.f32 %v496_v56  ;;  %v958_v62 = vmul.f32 %v4259_v41, %v936_v9  ;;  %v1083_v18 = vcombine.low %v988_v0, %v990_v53 }
 0x359   :  { %v3504_v5 = vpop.eup %3503  ;;  %v999_v54 = vcombine.low %v976_v19, %v978_v27  ;;  %v991_v59 = vcombine.low %v975_v44, %v977_v42  ;;  %v1075_v63 = vcombine.low %v987_v34, %v989_v11  ;;  %v979_v56 = vadd.f32 %v4274_v49, %v957_v38 }
 0x35a   :  { %v498_v40 = vadd.f32 1e-12, %v482_v50  ;;  %v938_v52 = vmul.f32 %v3504_v5, %v4160_v20  ;;  %v3506_v6 = vpop.eup %3505  ;;  %v4350_v57 = vrot.slane %v1194_v37, %v3821_v35  ;;  %v1211_v61 = vcombine.high %v4292_v33, %v4283_v1 }
 0x35b   :  { %v468_v39 = vpop.xlane.xlu0 %467  ;;  %v3508_v48 = vpop.eup %3507  ;;  %v1006_v20 = vrot.slane %v999_v54, %v3813_v28  ;;  %v4355_v30 = vrot.slane %v1067_v8, %v3813_v28  ;;  %v1007_v3 = vcombine.low %v979_v56, %v981_v46  ;;  %v998_v37 = vrot.slane %v991_v59, %v3813_v28 }
 0x35c   :  { %3517 = vrsqrt.f32 %v498_v40  ;;  %v484_v23 = vmul.f32 0.125, %v468_v39  ;;  %v960_v55 = vmul.f32 %v4259_v41, %v938_v52  ;;  %v980_v41 = vadd.f32 %v4274_v49, %v958_v62 }
 0x35d   :  { %v3510_v24 = vpop.eup %3509  ;;  %v527_v9 = vmul.f32 %v3508_v48, %v4164_v25  ;;  %v4363_v27 = vrot.slane %v1083_v18, %v3813_v28  ;;  %v4366_v8 = vrot.slane %v1210_v7, %v3821_v35  ;;  %v4369_v53 = vrot.slane %v1059_v45, %v3813_v28 }
 0x35e   :  { %v500_v47 = vadd.f32 1e-12, %v484_v23  ;;  %v3512_v51 = vpop.eup %3511  ;;  %v982_v22 = vadd.f32 %v4274_v49, %v960_v55  ;;  %v526_v50 = vmul.f32 %v3510_v24, %v4172_v60  ;;  %v4372_v49 = vrot.slane %v1075_v63, %v3813_v28 }
 0x35f   :  { %v525_v60 = vmul.f32 %v3506_v6, %v4154_v26  ;;  %v529_v19 = vmul.f32 %v3512_v51, %v4177_v4  ;;  %v1023_v34 = vcombine.low %v998_v37, %v1006_v20  ;;  %v1014_v38 = vrot.slane %v1007_v3, %v3813_v28 }
 0x360   :  { %3519 = vrsqrt.f32 %v500_v47  ;;  %v1015_v33 = vcombine.low %v980_v41, %v982_v22  ;;  %v1024_v5 = vcombine.high %v998_v37, %v1006_v20  ;;  %v549_v0 = vmul.f32 %v4225_v12, %v527_v9 }
 0x361   :  { %v3514_v1 = vpop.eup %3513  ;;  %v548_v39 = vmul.f32 %v4225_v12, %v526_v50  ;;  %v1091_v44 = vcombine.low %v4369_v53, %v4355_v30  ;;  %v1107_v26 = vcombine.low %v4372_v49, %v4363_v27  ;;  %v547_v62 = vmul.f32 %v4225_v12, %v525_v60 }
 0x362   :  { %v3516_v25 = vpop.eup %3515  ;;  %v531_v42 = vmul.f32 %v3514_v1, %v4190_v21  ;;  %v1022_v40 = vrot.slane %v1015_v33, %v3813_v28  ;;  %v551_v52 = vmul.f32 %v4225_v12, %v529_v19  ;;  %v1031_v6 = vrot.slane %v1023_v34, %v3821_v35 }
 0x363   :  { %v528_v11 = vmul.f32 %v3516_v25, %v4184_v2  ;;  %v1038_v59 = vrot.slane %v1024_v5, %v3821_v35  ;;  %v571_v48 = vadd.f32 %v4234_v36, %v549_v0  ;;  %v570_v63 = vadd.f32 %v4234_v36, %v548_v39 }
 0x364   :  { %v553_v21 = vmul.f32 %v4225_v12, %v531_v42  ;;  %v1039_v46 = vcombine.low %v1014_v38, %v1022_v40  ;;  %v1040_v54 = vcombine.high %v1014_v38, %v1022_v40  ;;  %v1209_v55 = vrot.slane %v1195_v43, %v3821_v35 }
 0x365   :  { %v550_v2 = vmul.f32 %v4225_v12, %v528_v11  ;;  %v1115_v51 = vrot.slane %v1107_v26, %v3821_v35  ;;  %v569_v41 = vadd.f32 %v4234_v36, %v547_v62  ;;  %v573_v58 = vadd.f32 %v4234_v36, %v551_v52 }
 0x366   :  { %v3518_v4 = vpop.eup %3517  ;;  %v1047_v18 = vrot.slane %v1039_v46, %v3821_v35  ;;  %v1054_v7 = vrot.slane %v1040_v54, %v3821_v35  ;;  %v575_v56 = vadd.f32 %v4234_v36, %v553_v21  ;;  %v1226_v10 = vcombine.low %v4350_v57, %v4366_v8 }
 0x367   :  { %v530_v23 = vmul.f32 %v3518_v4, %v4199_v32  ;;  %v572_v45 = vadd.f32 %v4234_v36, %v550_v2  ;;  %v1225_v32 = vrot.slane %v1211_v61, %v3821_v35  ;;  %v1099_v43 = vrot.slane %v1091_v44, %v3821_v35 }
 0x368   :  { %v4404_v24 = vcombine.low %v1031_v6, %v1047_v18  ;;  %v4406_v20 = vcombine.low %v1038_v59, %v1054_v7  ;;  %v1230_v61 = vcombine.low %v569_v41, %v571_v48  ;;  %v4789_v37 = vmov 0.0  }
 0x369   :  { %v1238_v22 = vcombine.low %v570_v63, %v572_v45  ;;  %v552_v3 = vmul.f32 %v4225_v12, %v530_v23  ;;  %v1228_v1 = vcombine.low %v1209_v55, %v1225_v32  ;;  %v4423_v33 = vcombine.high %v1031_v6, %v1047_v18  ;;  %v3288_v45 = vld [vmem:[%s4773_s1] ss:$0 sm:$0xff] }
 0x36a   :  { %v3520_v47 = vpop.eup %3519  ;;  %3352 = vmatpush3.xpose.msk.msra.mxu1 %vm1151_vm3, %v4404_v24  ;;  %3362 = vmatpush3.xpose.msk.msra.mxu0 %vm1151_vm3, %v4406_v20  ;;  %v4425_v25 = vcombine.low %v1099_v43, %v1115_v51  ;;  %v1227_v34 = vcombine.high %v4350_v57, %v4366_v8  ;;  %v4442_v11 = vcombine.high %v1038_v59, %v1054_v7 }
 0x36b   :  { %v532_v9 = vmul.f32 %v3520_v47, %v4205_v31  ;;  %3356 = vmatprep.subr.mxu1 %v4789_v37  ;;  %3371 = vmatprep.subr.mxu0 %v4789_v37  ;;  %v1246_v31 = vcombine.low %v573_v58, %v575_v56  ;;  %v574_v60 = vadd.f32 %v4234_v36, %v552_v3 }
 0x36c   :  { %v1108_v38 = vcombine.high %v4372_v49, %v4363_v27  ;;  %v1092_v5 = vcombine.high %v4369_v53, %v4355_v30  ;;  %v1229_v0 = vcombine.high %v1209_v55, %v1225_v32  ;;  %v4459_v39 = vcombine.high %v1099_v43, %v1115_v51 }
 0x36d   :  { %v554_v50 = vmul.f32 %v4225_v12, %v532_v9  ;;  %3354 = vmatmul.mubr.msk.f32.vlgmr.msra.gmra.mrb[0].mxu1 %vm1151_vm3, %v1226_v10  ;;  %3364 = vmatmul.mubr.msk.f32.vlgmr.msra.gmra.mrb[2].mxu0 %vm1151_vm3, %v1228_v1  ;;  %v1245_v12 = vrot.slane %v1238_v22, %v3813_v28  ;;  %v1253_v57 = vrot.slane %v1246_v31, %v3813_v28  ;;  %v3289_v10 = vld [vmem:[%s4773_s1 + $0x1] ss:$0 sm:$0xff]  ;;  %s3684_s1 = smov 16  }
 0x36e   :  { %3357 = vmatpush3.xpose.msk.msra.mxu1 %vm1151_vm3, %v4423_v33  ;;  %3372 = vmatpush3.xpose.msk.msra.mxu0 %vm1151_vm3, %v4425_v25  ;;  %v1122_v44 = vrot.slane %v1108_v38, %v3821_v35  ;;  %v1106_v30 = vrot.slane %v1092_v5, %v3821_v35 }
 0x36f   :  { %v576_v19 = vadd.f32 %v4234_v36, %v554_v50  ;;  %3358 = vmatprep.mubr.msk.f32.mxu1 %vm3683_vm2, %v4789_v37  ;;  %3366 = vmatprep.subr.mxu1 %v4789_v37  ;;  %v1237_v36 = vrot.slane %v1230_v61, %v3813_v28 }
 0x370   :  { %3373 = vmatprep.mubr.msk.f32.mxu0 %vm3683_vm2, %v4789_v37  ;;  %3381 = vmatprep.subr.mxu0 %v4789_v37  ;;  %v4472_v54 = vcombine.low %v1106_v30, %v1122_v44  ;;  %v4474_v62 = vcombine.high %v1106_v30, %v1122_v44 }
 0x371   :  { %v1254_v42 = vcombine.low %v574_v60, %v576_v19  ;;  %3359 = vmatmul.mubr.msk.f32.vlgmr.msra.gmra.mrb[2].mxu1 %vm1151_vm3, %v1227_v34  ;;  %v1262_v40 = vcombine.low %v1237_v36, %v1245_v12  ;;  %v1263_v21 = vcombine.high %v1237_v36, %v1245_v12 }
 0x372   :  { %3367 = vmatpush3.xpose.msk.msra.mxu1 %vm1151_vm3, %v4442_v11  ;;  %3368 = vmatprep.mubr.msk.f32.mxu1 %vm3683_vm2, %v4789_v37 }
 0x373   :  { %v1261_v8 = vrot.slane %v1254_v42, %v3813_v28  ;;  %3376 = vmatprep.subr.mxu1 %v4789_v37  ;;  %v1270_v26 = vrot.slane %v1262_v40, %v3821_v35  ;;  %v1277_v52 = vrot.slane %v1263_v21, %v3821_v35 }
 0x375   :  { %v1278_v27 = vcombine.low %v1253_v57, %v1261_v8  ;;  %v1279_v49 = vcombine.high %v1253_v57, %v1261_v8  ;;  %3369 = vmatmul.mubr.msk.f32.vlgmr.msra.gmra.mrb[4].mxu1 %vm1151_vm3, %v1229_v0 }
 0x376   :  { %3377 = vmatpush3.xpose.msk.msra.mxu1 %vm1151_vm3, %v4459_v39  ;;  %3378 = vmatprep.mubr.msk.f32.mxu1 %vm3683_vm2, %v4789_v37 }
 0x377   :  { %v1286_v4 = vrot.slane %v1278_v27, %v3821_v35  ;;  %3386 = vmatprep.subr.mxu1 %v4789_v37  ;;  %v1293_v46 = vrot.slane %v1279_v49, %v3821_v35 }
 0x379   :  { %v1294_v53 = vcombine.low %v1270_v26, %v1286_v4  ;;  %v1295_v2 = vcombine.high %v1270_v26, %v1286_v4  ;;  %v1296_v23 = vcombine.low %v1277_v52, %v1293_v46  ;;  %v1297_v6 = vcombine.high %v1277_v52, %v1293_v46 }
 0x37b   :  { %3374 = vmatmul.mubr.msk.f32.vlgmr.msra.gmra.mrb[4].mxu0 %vm1151_vm3, %v1294_v53  ;;  %3379 = vmatmul.mubr.msk.f32.vlgmr.msra.gmra.mrb[6].mxu1 %vm1151_vm3, %v1295_v2 }
 0x37c   :  { %3382 = vmatpush3.xpose.msk.msra.mxu0 %vm1151_vm3, %v4472_v54  ;;  %3387 = vmatpush3.xpose.msk.msra.mxu1 %vm1151_vm3, %v4474_v62 }
 0x37d   :  { %3383 = vmatprep.mubr.msk.f32.mxu0 %vm3683_vm2, %v4789_v37  ;;  %3388 = vmatprep.mubr.msk.f32.mxu1 %vm3683_vm2, %v4789_v37 }
 0x37e   :  { %3391 = vmatprep.subr.mxu0 %v4789_v37  ;;  %3396 = vmatprep.subr.mxu1 %v4789_v37 }
 0x37f   :  { %3384 = vmatmul.mubr.msk.f32.vlgmr.msra.gmra.mrb[6].mxu0 %vm1151_vm3, %v1296_v23  ;;  %3389 = vmatmul.mubr.msk.f32.vlgmr.msra.gmra.mrb[8].mxu1 %vm1151_vm3, %v1297_v6 }
 0x380   :  { %3393 = vmatprep.mubr.msk.f32.mxu0 %vm3683_vm2, %v4789_v37  ;;  %3398 = vmatprep.mubr.msk.f32.mxu1 %vm3683_vm2, %v4789_v37 }
 0x440   :  { %v1660_v18 = vpop.f32.mrb[0].mxu1  ;;  %v1810_v59 = vpop.f32.mrb[2].mxu0 }
 0x441   :  { %v2204_v7 = vadd.f32 %v3288_v45, %v1660_v18  ;;  %v3355_v48 = vpop.f32.mrb[1].mxu1  ;;  %v3365_v63 = vpop.f32.mrb[3].mxu0  ;;  %v2206_v55 = vadd.f32 %v3288_v45, %v1810_v59 }
 0x443   :  { %v2212_v32 = vsel %vm1151_vm3, %v2204_v7, -inf  ;;  %v2218_v41 = vsel %vm1151_vm3, %v2206_v55, -inf }
 0x444   :  { %2213 = vmax.xlane.f32.xlu1 %v2212_v32  ;;  %v1735_v47 = vpop.f32.mrb[2].mxu1 }
 0x445   :  { %v2205_v56 = vadd.f32 %v3288_v45, %v1735_v47  ;;  %v3360_v51 = vpop.f32.mrb[3].mxu1 }
 0x447   :  { %v2215_v22 = vsel %vm1151_vm3, %v2205_v56, -inf }
 0x448   :  { %2219 = vmax.xlane.f32.xlu1 %v2218_v41  ;;  %2216 = vmax.xlane.f32.xlu0 %v2215_v22  ;;  %v1885_v3 = vpop.f32.mrb[4].mxu1 }
 0x449   :  { %v2207_v9 = vadd.f32 %v3288_v45, %v1885_v3  ;;  %v3370_v58 = vpop.f32.mrb[5].mxu1 }
 0x44b   :  { %v2221_v43 = vsel %vm1151_vm3, %v2207_v9, -inf }
 0x44c   :  { %2222 = vmax.xlane.f32.xlu0 %v2221_v43 }
 0x44e   :  { %v1961_v61 = vpop.f32.mrb[4].mxu0  ;;  %v2036_v50 = vpop.f32.mrb[6].mxu1 }
 0x44f   :  { %v2208_v1 = vadd.f32 %v3289_v10, %v1961_v61  ;;  %v2209_v31 = vadd.f32 %v3289_v10, %v2036_v50  ;;  %v3375_v60 = vpop.f32.mrb[5].mxu0  ;;  %v3380_v19 = vpop.f32.mrb[7].mxu1 }
 0x451   :  { %v2227_v12 = vsel %vm1151_vm3, %v2209_v31, -inf  ;;  %v2224_v42 = vsel %vm1151_vm3, %v2208_v1, -inf }
 0x452   :  { %2228 = vmax.xlane.f32.xlu0 %v2227_v12  ;;  %v2186_v34 = vpop.f32.mrb[8].mxu1  ;;  %2225 = vmax.xlane.f32.xlu1 %v2224_v42  ;;  %v2111_v36 = vpop.f32.mrb[6].mxu0 }
 0x453   :  { %v2211_v38 = vadd.f32 %v3289_v10, %v2186_v34  ;;  %v2210_v57 = vadd.f32 %v3289_v10, %v2111_v36  ;;  %v3385_v8 = vpop.f32.mrb[7].mxu0  ;;  %v3390_v40 = vpop.f32.mrb[9].mxu1 }
 0x455   :  { %v2233_v5 = vsel %vm1151_vm3, %v2211_v38, -inf  ;;  %v2230_v0 = vsel %vm1151_vm3, %v2210_v57, -inf }
 0x456   :  { %2234 = vmax.xlane.f32.xlu0 %v2233_v5  ;;  %2231 = vmax.xlane.f32.xlu1 %v2230_v0 }
 0x467   :  { %1302 = vrot.lane.b32.xlu1 %v3797_v16, %s3682_s22 }
 0x46b   :  { %1306 = vrot.lane.b32.xlu1 %v3792_v14, %s3682_s22 }
 0x46c   :  { %1298 = vrot.lane.b32.xlu0 %v3794_v15, %s3682_s22 }
 0x46f   :  { %1300 = vrot.lane.b32.xlu1 %v3801_v17, %s3682_s22 }
 0x470   :  { %161 = vrot.lane.b32.xlu0 %v3785_v13, %s3682_s22 }
 0x4d1   :  { %v2214_v27 = vpop.xlane.xlu1 %2213 }
 0x4d2   :  { %v2236_v49 = vsub.f32 %v2204_v7, %v2214_v27 }
 0x4d4   :  { %v2244_v44 = vmul.f32 1.442695, %v2236_v49 }
 0x4d5   :  { %v2220_v26 = vpop.xlane.xlu1 %2219  ;;  %v2217_v4 = vpop.xlane.xlu0 %2216 }
 0x4d6   :  { %3521 = vpow2.f32 %v2244_v44  ;;  %v2238_v21 = vsub.f32 %v2206_v55, %v2220_v26  ;;  %v2237_v16 = vsub.f32 %v2205_v56, %v2217_v4 }
 0x4d8   :  { %v2248_v30 = vmul.f32 1.442695, %v2238_v21  ;;  %v2246_v53 = vmul.f32 1.442695, %v2237_v16 }
 0x4d9   :  { %v2223_v14 = vpop.xlane.xlu0 %2222 }
 0x4da   :  { %3523 = vpow2.f32 %v2248_v30  ;;  %v2239_v2 = vsub.f32 %v2207_v9, %v2223_v14 }
 0x4db   :  { %3525 = vpow2.f32 %v2246_v53 }
 0x4dc   :  { %v2250_v15 = vmul.f32 1.442695, %v2239_v2 }
 0x4de   :  { %3527 = vpow2.f32 %v2250_v15 }
 0x4df   :  { %v2226_v46 = vpop.xlane.xlu1 %2225  ;;  %v2229_v17 = vpop.xlane.xlu0 %2228 }
 0x4e0   :  { %v2240_v52 = vsub.f32 %v2208_v1, %v2226_v46  ;;  %v2241_v13 = vsub.f32 %v2209_v31, %v2229_v17  ;;  %v4519_v23 = vpop.eup %3521 }
 0x4e1   :  { %v2260_v18 = vsel %vm1151_vm3, %v4519_v23, 0.0 }
 0x4e2   :  { %v2252_v6 = vmul.f32 1.442695, %v2240_v52  ;;  %v2254_v45 = vmul.f32 1.442695, %v2241_v13  ;;  %2261 = vadd.xlane.f32.xlu1 %v2260_v18 }
 0x4e3   :  { %v2232_v59 = vpop.xlane.xlu1 %2231  ;;  %v2235_v7 = vpop.xlane.xlu0 %2234 }
 0x4e4   :  { %3529 = vpow2.f32 %v2252_v6  ;;  %v2242_v48 = vsub.f32 %v2210_v57, %v2232_v59  ;;  %v2243_v63 = vsub.f32 %v2211_v38, %v2235_v7  ;;  %v4523_v55 = vpop.eup %3523 }
 0x4e5   :  { %3531 = vpow2.f32 %v2254_v45  ;;  %v4525_v56 = vpop.eup %3525  ;;  %v2266_v51 = vsel %vm1151_vm3, %v4523_v55, 0.0 }
 0x4e6   :  { %v2256_v32 = vmul.f32 1.442695, %v2242_v48  ;;  %v2258_v47 = vmul.f32 1.442695, %v2243_v63  ;;  %2267 = vadd.xlane.f32.xlu1 %v2266_v51  ;;  %v2263_v3 = vsel %vm1151_vm3, %v4525_v56, 0.0 }
 0x4e7   :  { %v1303_v41 = vpop.permute.xlu1 %1302  ;;  %v1299_v22 = vpop.permute.xlu0 %1298  ;;  %2264 = vadd.xlane.f32.xlu0 %v2263_v3  ;;  %v4791_v3 = vld [vmem:[#allocation16_spill] sm:$0xff] }
 0x4e8   :  { %3533 = vpow2.f32 %v2256_v32  ;;  %v4531_v9 = vpop.eup %3527  ;;  %v1316_v58 = vcombine.low %v4322_v29, %v1303_v41  ;;  %v1317_v10 = vcombine.high %v4322_v29, %v1303_v41 }
 0x4e9   :  { %3535 = vpow2.f32 %v2258_v47  ;;  %v2269_v61 = vsel %vm1151_vm3, %v4531_v9, 0.0 }
 0x4ea   :  { %v1324_v19 = vrot.slane %v1316_v58, %v3813_v28  ;;  %v1331_v12 = vrot.slane %v1317_v10, %v3813_v28 }
 0x4eb   :  { %v1307_v43 = vpop.permute.xlu1 %1306  ;;  %v4537_v50 = vpop.permute.xlu0 %161  ;;  %2270 = vadd.xlane.f32.xlu0 %v2269_v61 }
 0x4ec   :  { %v1332_v1 = vcombine.low %v1299_v22, %v1307_v43  ;;  %v1333_v31 = vcombine.high %v1299_v22, %v1307_v43  ;;  %166 = vst.msk [vmem:[#allocation10 + $0x8] sm:$0xff] %vm75_vm0, %v4537_v50  ;;  %v4790_v22 = vld [vmem:[#allocation15_spill] sm:$0xff] }
 0x4ee   :  { %v4541_v60 = vpop.eup %3529  ;;  %v1340_v29 = vrot.slane %v1332_v1, %v3813_v28  ;;  %v1347_v42 = vrot.slane %v1333_v31, %v3813_v28 }
 0x4ef   :  { %v4547_v34 = vpop.eup %3531  ;;  %v2272_v36 = vsel %vm1151_vm3, %v4541_v60, 0.0 }
 0x4f0   :  { %v1348_v38 = vcombine.low %v1324_v19, %v1340_v29  ;;  %v1349_v57 = vcombine.high %v1324_v19, %v1340_v29  ;;  %v1364_v8 = vcombine.low %v1331_v12, %v1347_v42  ;;  %v1365_v40 = vcombine.high %v1331_v12, %v1347_v42  ;;  %2273 = vadd.xlane.f32.xlu1 %v2272_v36 }
 0x4f1   :  { %v2275_v5 = vsel %vm1151_vm3, %v4547_v34, 0.0 }
 0x4f2   :  { %v4553_v0 = vpop.eup %3533  ;;  %v1356_v27 = vrot.slane %v1348_v38, %v3821_v35  ;;  %v1363_v49 = vrot.slane %v1349_v57, %v3821_v35  ;;  %v1372_v44 = vrot.slane %v1364_v8, %v3821_v35  ;;  %v1379_v26 = vrot.slane %v1365_v40, %v3821_v35  ;;  %2276 = vadd.xlane.f32.xlu0 %v2275_v5 }
 0x4f3   :  { %v4559_v4 = vpop.eup %3535  ;;  %v2278_v21 = vsel %vm1151_vm3, %v4553_v0, 0.0 }
 0x4f4   :  { %v1452_v16 = vcombine.low %v1356_v27, %v1363_v49  ;;  %v3268_v30 = vcombine.high %v1356_v27, %v1363_v49  ;;  %v1468_v53 = vcombine.low %v1372_v44, %v1379_v26  ;;  %v3269_v14 = vcombine.high %v1372_v44, %v1379_v26  ;;  %2279 = vadd.xlane.f32.xlu1 %v2278_v21 }
 0x4f5   :  { %v2281_v2 = vsel %vm1151_vm3, %v4559_v4, 0.0 }
 0x4f6   :  { %v1459_v15 = vrot.slane %v1452_v16, %v3813_v28  ;;  %v1467_v46 = vrot.slane %v3268_v30, %v3813_v28  ;;  %v1475_v17 = vrot.slane %v1468_v53, %v3813_v28  ;;  %v1483_v52 = vrot.slane %v3269_v14, %v3813_v28  ;;  %2282 = vadd.xlane.f32.xlu0 %v2281_v2 }
 0x4f8   :  { %v1484_v13 = vcombine.low %v1459_v15, %v1467_v46  ;;  %v1500_v6 = vcombine.low %v1475_v17, %v1483_v52  ;;  %v1485_v45 = vcombine.high %v1459_v15, %v1467_v46  ;;  %v1501_v18 = vcombine.high %v1475_v17, %v1483_v52 }
 0x4fa   :  { %v1492_v59 = vrot.slane %v1484_v13, %v3821_v35  ;;  %v1508_v7 = vrot.slane %v1500_v6, %v3821_v35  ;;  %v4572_v48 = vrot.slane %v1485_v45, %v3821_v35  ;;  %v4575_v63 = vrot.slane %v1501_v18, %v3821_v35 }
 0x4fc   :  { %v1516_v32 = vcombine.low %v1492_v59, %v1508_v7  ;;  %v1517_v47 = vcombine.high %v1492_v59, %v1508_v7  ;;  %v1518_v51 = vcombine.low %v4572_v48, %v4575_v63  ;;  %v1519_v41 = vcombine.high %v4572_v48, %v4575_v63 }
 0x4fe   :  { %3392 = vmatpush3.msra.mxu0 %v1516_v32  ;;  %3397 = vmatpush3.msra.mxu1 %v1517_v47 }
 0x4ff   :  { %3401 = vmatprep.subr.mxu0 %v4789_v37  ;;  %3406 = vmatprep.subr.mxu1 %v4789_v37 }
 0x505   :  { %1308 = vrot.lane.b32.xlu1 %v4790_v22, %s3682_s22 }
 0x509   :  { %1131 = vrot.lane.b32.xlu1 %v4459_v39, %s3673_s24  ;;  %v1301_v39 = vpop.permute.xlu1 %1300 }
 0x50c   :  { %1304 = vrot.lane.b32.xlu0 %v4791_v3, %s3682_s22 }
 0x50d   :  { %1139 = vrot.lane.b32.xlu1 %v4472_v54, %s3684_s1 }
 0x510   :  { %1129 = vrot.lane.b32.xlu0 %v4423_v33, %s3673_s24 }
 0x511   :  { %1147 = vrot.lane.b32.xlu1 %v4474_v62, %s3685_s13 }
 0x514   :  { %1137 = vrot.lane.b32.xlu0 %v4406_v20, %s3684_s1 }
 0x518   :  { %1145 = vrot.lane.b32.xlu0 %v4442_v11, %s3685_s13 }
 0x56f   :  { %v2262_v58 = vpop.xlane.xlu1 %2261 }
 0x570   :  { %3537 = vrcp.f32 %v2262_v58 }
 0x573   :  { %v2268_v10 = vpop.xlane.xlu1 %2267 }
 0x574   :  { %3539 = vrcp.f32 %v2268_v10  ;;  %v2265_v43 = vpop.xlane.xlu0 %2264 }
 0x575   :  { %3541 = vrcp.f32 %v2265_v43 }
 0x578   :  { %v2271_v54 = vpop.xlane.xlu0 %2270 }
 0x579   :  { %3543 = vrcp.f32 %v2271_v54 }
 0x57a   :  { %v3538_v33 = vpop.eup %3537 }
 0x57b   :  { %v2292_v61 = vmul.f32 %v3538_v33, %v2262_v58 }
 0x57d   :  { %v2274_v1 = vpop.xlane.xlu1 %2273  ;;  %v2300_v31 = vsub.f32 2.0, %v2292_v61 }
 0x57e   :  { %3545 = vrcp.f32 %v2274_v1  ;;  %v3540_v19 = vpop.eup %3539 }
 0x57f   :  { %v2277_v62 = vpop.xlane.xlu0 %2276  ;;  %v3542_v20 = vpop.eup %3541  ;;  %v2308_v12 = vmul.f32 %v3538_v33, %v2300_v31  ;;  %v2294_v11 = vmul.f32 %v3540_v19, %v2268_v10 }
 0x580   :  { %3547 = vrcp.f32 %v2277_v62  ;;  %v2293_v42 = vmul.f32 %v3542_v20, %v2265_v43 }
 0x581   :  { %v4599_v29 = vpop.xlane.xlu1 %2279  ;;  %v2316_v36 = vmul.f32 %v4519_v23, %v2308_v12  ;;  %v2302_v38 = vsub.f32 2.0, %v2294_v11 }
 0x582   :  { %v2301_v8 = vsub.f32 2.0, %v2293_v42  ;;  %3549 = vrcp.f32 %v4599_v29 }
 0x583   :  { %v4602_v57 = vpop.xlane.xlu0 %2282  ;;  %v3544_v40 = vpop.eup %3543  ;;  %v2310_v5 = vmul.f32 %v3540_v19, %v2302_v38  ;;  %3394 = vmatmul.mubr.msk.f32.vlgmr.msra.gmra.mrb[8].mxu0 %vm1151_vm3, %v2316_v36 }
 0x584   :  { %3551 = vrcp.f32 %v4602_v57  ;;  %v2309_v49 = vmul.f32 %v3542_v20, %v2301_v8  ;;  %v2295_v44 = vmul.f32 %v3544_v40, %v2271_v54  ;;  %3402 = vmatpush3.msra.mxu0 %v1518_v51  ;;  %3403 = vmatprep.mubr.msk.f32.mxu0 %vm3683_vm2, %v4789_v37 }
 0x585   :  { %v1309_v27 = vpop.permute.xlu1 %1308  ;;  %v2318_v23 = vmul.f32 %v4523_v55, %v2310_v5  ;;  %3411 = vmatprep.subr.mxu0 %v4789_v37 }
 0x586   :  { %v1400_v26 = vcombine.low %v1301_v39, %v1309_v27  ;;  %v1401_v21 = vcombine.high %v1301_v39, %v1309_v27  ;;  %v2317_v30 = vmul.f32 %v4525_v56, %v2309_v49  ;;  %v2303_v53 = vsub.f32 2.0, %v2295_v44 }
 0x587   :  { %v1305_v16 = vpop.permute.xlu0 %1304  ;;  %3404 = vmatmul.mubr.msk.f32.vlgmr.msra.gmra.mrb[10].mxu0 %vm1151_vm3, %v2318_v23 }
 0x588   :  { %v3546_v14 = vpop.eup %3545  ;;  %v1408_v2 = vrot.slane %v1400_v26, %v3813_v28  ;;  %v1384_v15 = vcombine.low %v4537_v50, %v1305_v16  ;;  %v1385_v46 = vcombine.high %v4537_v50, %v1305_v16  ;;  %v2311_v52 = vmul.f32 %v3544_v40, %v2303_v53  ;;  %3399 = vmatmul.mubr.msk.f32.vlgmr.msra.gmra.mrb[10].mxu1 %vm1151_vm3, %v2317_v30 }
 0x589   :  { %v1132_v17 = vpop.permute.xlu1 %1131  ;;  %v1415_v13 = vrot.slane %v1401_v21, %v3813_v28  ;;  %3413 = vmatprep.mubr.msk.f32.mxu0 %vm3683_vm2, %v4789_v37  ;;  %3407 = vmatpush3.msra.mxu1 %v1519_v41  ;;  %v2296_v18 = vmul.f32 %v3546_v14, %v2274_v1 }
 0x58a   :  { %v3548_v55 = vpop.eup %3547  ;;  %v1392_v56 = vrot.slane %v1384_v15, %v3813_v28  ;;  %v1399_v6 = vrot.slane %v1385_v46, %v3813_v28  ;;  %3408 = vmatprep.mubr.msk.f32.mxu1 %vm3683_vm2, %v4789_v37  ;;  %v2319_v45 = vmul.f32 %v4531_v9, %v2311_v52  ;;  %3416 = vmatprep.subr.mxu1 %v4789_v37 }
 0x58b   :  { %v1130_v50 = vpop.permute.xlu0 %1129  ;;  %v2297_v59 = vmul.f32 %v3548_v55, %v2277_v62  ;;  %v1153_v63 = vsel %vm1151_vm3, %v4425_v25, %v1132_v17  ;;  %v2304_v43 = vsub.f32 2.0, %v2296_v18 }
 0x58c   :  { %v1416_v7 = vcombine.low %v1392_v56, %v1408_v2  ;;  %v3550_v47 = vpop.eup %3549  ;;  %v1417_v51 = vcombine.high %v1392_v56, %v1408_v2  ;;  %v1432_v22 = vcombine.low %v1399_v6, %v1415_v13  ;;  %v1433_v3 = vcombine.high %v1399_v6, %v1415_v13  ;;  %3409 = vmatmul.mubr.msk.f32.vlgmr.msra.gmra.mrb[12].mxu1 %vm1151_vm3, %v2319_v45 }
 0x58d   :  { %v1140_v32 = vpop.permute.xlu1 %1139  ;;  %3418 = vmatprep.mubr.msk.f32.mxu1 %vm3683_vm2, %v4789_v37  ;;  %v2305_v54 = vsub.f32 2.0, %v2297_v59  ;;  %v1152_v33 = vsel %vm1151_vm3, %v4404_v24, %v1130_v50  ;;  %v2298_v20 = vmul.f32 %v3550_v47, %v4599_v29  ;;  %v2312_v44 = vmul.f32 %v3546_v14, %v2304_v43 }
 0x58e   :  { %v3552_v48 = vpop.eup %3551  ;;  %v1424_v9 = vrot.slane %v1416_v7, %v3821_v35  ;;  %v1431_v39 = vrot.slane %v1417_v51, %v3821_v35  ;;  %v1440_v58 = vrot.slane %v1432_v22, %v3821_v35  ;;  %v1447_v10 = vrot.slane %v1433_v3, %v3821_v35 }
 0x58f   :  { %v1138_v41 = vpop.permute.xlu0 %1137  ;;  %v1156_v25 = vsel %vm1154_vm4, %v1153_v63, %v1140_v32  ;;  %v2299_v12 = vmul.f32 %v3552_v48, %v4602_v57  ;;  %v2313_v26 = vmul.f32 %v3548_v55, %v2305_v54  ;;  %v2306_v21 = vsub.f32 2.0, %v2298_v20 }
 0x590   :  { %v1520_v1 = vcombine.low %v1424_v9, %v1431_v39  ;;  %v3270_v31 = vcombine.high %v1424_v9, %v1431_v39  ;;  %v1536_v62 = vcombine.low %v1440_v58, %v1447_v10  ;;  %v3271_v19 = vcombine.high %v1440_v58, %v1447_v10 }
 0x591   :  { %v1148_v61 = vpop.permute.xlu1 %1147  ;;  %v1155_v11 = vsel %vm1154_vm4, %v1152_v33, %v1138_v41  ;;  %v2307_v23 = vsub.f32 2.0, %v2299_v12  ;;  %v2320_v17 = vmul.f32 %v4541_v60, %v2312_v44  ;;  %v2321_v52 = vmul.f32 %v4547_v34, %v2313_v26 }
 0x592   :  { %v1159_v42 = vsel %vm1157_vm5, %v1156_v25, %v1148_v61  ;;  %v1527_v38 = vrot.slane %v1520_v1, %v3813_v28  ;;  %v1535_v24 = vrot.slane %v3270_v31, %v3813_v28  ;;  %v1543_v8 = vrot.slane %v1536_v62, %v3813_v28 }
 0x593   :  { %v1146_v36 = vpop.permute.xlu0 %1145  ;;  %v1551_v40 = vrot.slane %v3271_v19, %v3813_v28  ;;  %1161 = vst.msk [vmem:[#allocation8 + $0x8] sm:$0xff] %vm75_vm0, %v1159_v42  ;;  %v2314_v13 = vmul.f32 %v3550_v47, %v2306_v21  ;;  %v2315_v56 = vmul.f32 %v3552_v48, %v2307_v23 }
 0x594   :  { %v1158_v5 = vsel %vm1157_vm5, %v1155_v11, %v1146_v36  ;;  %v1552_v29 = vcombine.low %v1527_v38, %v1535_v24  ;;  %v1553_v27 = vcombine.high %v1527_v38, %v1535_v24 }
 0x595   :  { %1160 = vst.msk [vmem:[#allocation8] sm:$0xff] %vm75_vm0, %v1158_v5  ;;  %v1568_v57 = vcombine.low %v1543_v8, %v1551_v40  ;;  %v1569_v49 = vcombine.high %v1543_v8, %v1551_v40  ;;  %v2322_v6 = vmul.f32 %v4553_v0, %v2314_v13  ;;  %v2323_v60 = vmul.f32 %v4559_v4, %v2315_v56 }
 0x596   :  { %v1560_v16 = vrot.slane %v1552_v29, %v3821_v35  ;;  %v1567_v53 = vrot.slane %v1553_v27, %v3821_v35 }
 0x597   :  { %v1576_v30 = vrot.slane %v1568_v57, %v3821_v35  ;;  %v1583_v2 = vrot.slane %v1569_v49, %v3821_v35 }
 0x599   :  { %v1584_v15 = vcombine.low %v1560_v16, %v1576_v30  ;;  %v1585_v46 = vcombine.high %v1560_v16, %v1576_v30  ;;  %v1586_v14 = vcombine.low %v1567_v53, %v1583_v2  ;;  %v1587_v55 = vcombine.high %v1567_v53, %v1583_v2 }
 0x59b   :  { %3412 = vmatpush3.msra.mxu0 %v1584_v15  ;;  %3417 = vmatpush3.msra.mxu1 %v1585_v46 }
 0x59c   :  { %3414 = vmatmul.mubr.msk.f32.vlgmr.msra.gmra.mrb[12].mxu0 %vm1151_vm3, %v2320_v17  ;;  %3419 = vmatmul.mubr.msk.f32.vlgmr.msra.gmra.mrb[14].mxu1 %vm1151_vm3, %v2321_v52 }
 0x59d   :  { %3421 = vmatprep.subr.mxu0 %v4789_v37  ;;  %3426 = vmatprep.subr.mxu1 %v4789_v37 }
 0x59e   :  { %3422 = vmatpush3.msra.mxu0 %v1586_v14  ;;  %3427 = vmatpush3.msra.mxu1 %v1587_v55 }
 0x59f   :  { %3423 = vmatprep.mubr.msk.f32.mxu0 %vm3683_vm2, %v4789_v37  ;;  %3428 = vmatprep.mubr.msk.f32.mxu1 %vm3683_vm2, %v4789_v37 }
 0x5a0   :  { %3424 = vmatmul.mubr.msk.f32.vlgmr.msra.gmra.mrb[14].mxu0 %vm1151_vm3, %v2322_v6  ;;  %3429 = vmatmul.mubr.msk.f32.vlgmr.msra.gmra.mrb[16].mxu1 %vm1151_vm3, %v2323_v60 }
 0x656   :  { %v2393_v34 = vpop.f32.mrb[8].mxu0 }
 0x657   :  { %v3395_v50 = vpop.f32.mrb[9].mxu0 }
 0x65a   :  { %v2539_v45 = vpop.f32.mrb[10].mxu0 }
 0x65b   :  { %v2466_v18 = vpop.f32.mrb[10].mxu1  ;;  %v2908_v59 = vcombine.low %v2393_v34, %v2539_v45  ;;  %v2909_v0 = vcombine.high %v2393_v34, %v2539_v45  ;;  %v3405_v7 = vpop.f32.mrb[11].mxu0 }
 0x65c   :  { %v3400_v4 = vpop.f32.mrb[11].mxu1 }
 0x65d   :  { %v2916_v3 = vrot.slane %v2908_v59, %v3813_v28  ;;  %v2923_v37 = vrot.slane %v2909_v0, %v3813_v28 }
 0x65f   :  { %v2612_v32 = vpop.f32.mrb[12].mxu1 }
 0x660   :  { %v2924_v47 = vcombine.low %v2466_v18, %v2612_v32  ;;  %v2925_v51 = vcombine.high %v2466_v18, %v2612_v32  ;;  %v3410_v22 = vpop.f32.mrb[13].mxu1 }
 0x662   :  { %v2932_v48 = vrot.slane %v2924_v47, %v3813_v28  ;;  %v2939_v63 = vrot.slane %v2925_v51, %v3813_v28 }
 0x664   :  { %v2940_v41 = vcombine.low %v2916_v3, %v2932_v48  ;;  %v2941_v9 = vcombine.high %v2916_v3, %v2932_v48  ;;  %v2956_v39 = vcombine.low %v2923_v37, %v2939_v63  ;;  %v2957_v58 = vcombine.high %v2923_v37, %v2939_v63 }
 0x666   :  { %v2948_v10 = vrot.slane %v2940_v41, %v3821_v35  ;;  %v2955_v43 = vrot.slane %v2941_v9, %v3821_v35  ;;  %v2964_v54 = vrot.slane %v2956_v39, %v3821_v35  ;;  %v2971_v33 = vrot.slane %v2957_v58, %v3821_v35 }
 0x668   :  { %v3044_v25 = vcombine.low %v2948_v10, %v2955_v43  ;;  %v3298_v61 = vcombine.high %v2948_v10, %v2955_v43  ;;  %v3060_v1 = vcombine.low %v2964_v54, %v2971_v33  ;;  %v3299_v31 = vcombine.high %v2964_v54, %v2971_v33 }
 0x66a   :  { %v3051_v62 = vrot.slane %v3044_v25, %v3813_v28  ;;  %v3059_v19 = vrot.slane %v3298_v61, %v3813_v28  ;;  %v3067_v20 = vrot.slane %v3060_v1, %v3813_v28  ;;  %v3075_v12 = vrot.slane %v3299_v31, %v3813_v28 }
 0x66c   :  { %v3076_v11 = vcombine.low %v3051_v62, %v3059_v19  ;;  %v3092_v42 = vcombine.low %v3067_v20, %v3075_v12  ;;  %v3077_v36 = vcombine.high %v3051_v62, %v3059_v19  ;;  %v3093_v38 = vcombine.high %v3067_v20, %v3075_v12 }
 0x66e   :  { %v4683_v40 = vrot.slane %v3076_v11, %v3821_v35  ;;  %v4686_v5 = vrot.slane %v3092_v42, %v3821_v35  ;;  %v3091_v29 = vrot.slane %v3077_v36, %v3821_v35  ;;  %v3107_v57 = vrot.slane %v3093_v38, %v3821_v35 }
 0x66f   :  { %v2685_v24 = vpop.f32.mrb[12].mxu0  ;;  %v2758_v8 = vpop.f32.mrb[14].mxu1 }
 0x670   :  { %v3415_v27 = vpop.f32.mrb[13].mxu0  ;;  %v3420_v49 = vpop.f32.mrb[15].mxu1  ;;  %v3109_v44 = vcombine.high %v4683_v40, %v4686_v5  ;;  %v3110_v26 = vcombine.low %v3091_v29, %v3107_v57  ;;  %v3111_v21 = vcombine.high %v3091_v29, %v3107_v57  ;;  %v3108_v23 = vcombine.low %v4683_v40, %v4686_v5 }
 0x672   :  { %3182 = vrot.lane.b32.xlu0 %v3109_v44, %s3673_s24 }
 0x673   :  { %v2831_v16 = vpop.f32.mrb[14].mxu0  ;;  %v2904_v30 = vpop.f32.mrb[16].mxu1 }
 0x674   :  { %v2976_v53 = vcombine.low %v2685_v24, %v2831_v16  ;;  %v2977_v2 = vcombine.high %v2685_v24, %v2831_v16  ;;  %v2992_v15 = vcombine.low %v2758_v8, %v2904_v30  ;;  %v2993_v46 = vcombine.high %v2758_v8, %v2904_v30  ;;  %v3425_v17 = vpop.f32.mrb[15].mxu0  ;;  %v3430_v52 = vpop.f32.mrb[17].mxu1 }
 0x676   :  { %v2984_v13 = vrot.slane %v2976_v53, %v3813_v28  ;;  %v2991_v56 = vrot.slane %v2977_v2, %v3813_v28  ;;  %v3000_v14 = vrot.slane %v2992_v15, %v3813_v28  ;;  %v3007_v55 = vrot.slane %v2993_v46, %v3813_v28  ;;  %3190 = vrot.lane.b32.xlu0 %v3110_v26, %s3684_s1 }
 0x678   :  { %v3008_v6 = vcombine.low %v2984_v13, %v3000_v14  ;;  %v3009_v60 = vcombine.high %v2984_v13, %v3000_v14  ;;  %v3024_v34 = vcombine.low %v2991_v56, %v3007_v55  ;;  %v3025_v50 = vcombine.high %v2991_v56, %v3007_v55 }
 0x67a   :  { %v3016_v45 = vrot.slane %v3008_v6, %v3821_v35  ;;  %v3023_v18 = vrot.slane %v3009_v60, %v3821_v35  ;;  %v3032_v59 = vrot.slane %v3024_v34, %v3821_v35  ;;  %v3039_v0 = vrot.slane %v3025_v50, %v3821_v35  ;;  %3198 = vrot.lane.b32.xlu0 %v3111_v21, %s3685_s13 }
 0x67c   :  { %v3112_v7 = vcombine.low %v3016_v45, %v3023_v18  ;;  %v3300_v4 = vcombine.high %v3016_v45, %v3023_v18  ;;  %v3128_v32 = vcombine.low %v3032_v59, %v3039_v0  ;;  %v3301_v47 = vcombine.high %v3032_v59, %v3039_v0 }
 0x67e   :  { %v3119_v51 = vrot.slane %v3112_v7, %v3813_v28  ;;  %v3127_v22 = vrot.slane %v3300_v4, %v3813_v28  ;;  %v3135_v3 = vrot.slane %v3128_v32, %v3813_v28  ;;  %v3143_v37 = vrot.slane %v3301_v47, %v3813_v28 }
 0x680   :  { %v3144_v48 = vcombine.low %v3119_v51, %v3127_v22  ;;  %v3160_v63 = vcombine.low %v3135_v3, %v3143_v37  ;;  %v3145_v41 = vcombine.high %v3119_v51, %v3127_v22  ;;  %v3161_v9 = vcombine.high %v3135_v3, %v3143_v37 }
 0x682   :  { %v3152_v39 = vrot.slane %v3144_v48, %v3821_v35  ;;  %v3168_v58 = vrot.slane %v3160_v63, %v3821_v35  ;;  %v3159_v10 = vrot.slane %v3145_v41, %v3821_v35  ;;  %v3175_v43 = vrot.slane %v3161_v9, %v3821_v35 }
 0x683   :  { %3608 = shalt.err (!%p3605_p6)
}
 0x684   :  { %s3609_s2 = scalar_lea.hbm %s4781_s9, 256 }
 0x685   :  { %p3610_p7 = scmp.ne.s32.totalorder %s4781_s9, %s3609_s2  ;;  %p3613_p8 = scmp.lt.u32.totalorder %s3609_s2, %s4781_s9 }
 0x687   :  { %p3615_p9 = pnand %p3613_p8, %p3610_p7 }
 0x689   :  { %3618 = shalt.err (!%p3615_p9)
}
 0x68a   :  { %3235 = dma.vmem_to_hbm [thread:$0]  %s3230_s16, 256, %s4781_s9, [#allocation9], %s3672_s23, %s3672_s23, %s3673_s24   ;;  %v3177_v28 = vcombine.high %v3152_v39, %v3168_v58  ;;  %v3178_v35 = vcombine.low %v3159_v10, %v3175_v43  ;;  %v3179_v54 = vcombine.high %v3159_v10, %v3175_v43  ;;  %v3176_v33 = vcombine.low %v3152_v39, %v3168_v58 }
 0x68b   :  { %s3687_s25 = smov [#allocation10]  }
 0x68c   :  { %s3241_s26 = sshll.u32 %s3687_s25, 4  ;;  %3184 = vrot.lane.b32.xlu1 %v3177_v28, %s3673_s24  ;;  %s3242_s26 = int_to_ptr.vmem [resolvable:$true] %s3241_s26 }
 0x68d   :  { %s3619_s4 = scalar_lea.vmem %s3242_s26, 256  ;;  %p3624_p11 = scmp.lt.s32.totalorder %s3242_s26, %s3242_s26 }
 0x68e   :  { %p3620_p10 = scmp.ne.s32.totalorder %s3242_s26, %s3619_s4  ;;  %p3625_p12 = scmp.lt.s32.totalorder %s3619_s4, %s3619_s4 }
 0x690   :  { %p3626_p13 = por %p3625_p12, %p3624_p11 }
 0x692   :  { %p3627_p0 = pnand %p3626_p13, %p3620_p10 }
 0x694   :  { %3630 = shalt.err (!%p3627_p0)
}
 0x695   :  { %s3631_s9 = scalar_lea.hbm %s4782_s10, 256 }
 0x696   :  { %p3632_p1 = scmp.ne.s32.totalorder %s4782_s10, %s3631_s9  ;;  %p3635_p2 = scmp.lt.u32.totalorder %s3631_s9, %s4782_s10 }
 0x698   :  { %p3637_p3 = pnand %p3635_p2, %p3632_p1 }
 0x69a   :  { %3640 = shalt.err (!%p3637_p3)
}
 0x69b   :  { %3247 = dma.vmem_to_hbm [thread:$0]  %s3242_s26, 256, %s4782_s10, [#allocation9], %s3672_s23, %s3672_s23, %s3673_s24  }
 0x69c   :  { %3192 = vrot.lane.b32.xlu1 %v3178_v35, %s3684_s1  ;;  %s3688_s10 = smov [#allocation7]  }
 0x69d   :  { %s3217_s12 = sshll.u32 %s3688_s10, 4  ;;  %s3218_s12 = int_to_ptr.vmem [resolvable:$true] %s3217_s12 }
 0x69e   :  { %s3641_s1 = scalar_lea.vmem %s3218_s12, 256  ;;  %p3646_p5 = scmp.lt.s32.totalorder %s3218_s12, %s3218_s12 }
 0x69f   :  { %p3642_p4 = scmp.ne.s32.totalorder %s3218_s12, %s3641_s1  ;;  %p3647_p6 = scmp.lt.s32.totalorder %s3641_s1, %s3641_s1 }
 0x6a0   :  { %3200 = vrot.lane.b32.xlu1 %v3179_v54, %s3685_s13 }
 0x6a1   :  { %p3648_p7 = por %p3647_p6, %p3646_p5 }
 0x6a3   :  { %p3649_p8 = pnand %p3648_p7, %p3642_p4 }
 0x6e4   :  { %v3183_v25 = vpop.permute.xlu0 %3182 }
 0x6e5   :  { %v3204_v1 = vsel %vm1151_vm3, %v3108_v23, %v3183_v25 }
 0x6e8   :  { %v3191_v61 = vpop.permute.xlu0 %3190 }
 0x6e9   :  { %v3206_v31 = vsel %vm1154_vm4, %v3204_v1, %v3191_v61 }
 0x6ec   :  { %v3199_v62 = vpop.permute.xlu0 %3198 }
 0x6ed   :  { %v3208_v19 = vsel %vm1157_vm5, %v3206_v31, %v3199_v62 }
 0x6ee   :  { %3210 = vst.msk [vmem:[#allocation7] sm:$0xff] %vm75_vm0, %v3208_v19 }
 0x6fe   :  { %v3185_v20 = vpop.permute.xlu1 %3184 }
 0x6ff   :  { %v3205_v11 = vsel %vm1151_vm3, %v3176_v33, %v3185_v20 }
 0x70e   :  { %v3193_v12 = vpop.permute.xlu1 %3192 }
 0x70f   :  { %v3207_v42 = vsel %vm1154_vm4, %v3205_v11, %v3193_v12 }
 0x712   :  { %v3201_v36 = vpop.permute.xlu1 %3200 }
 0x713   :  { %v3209_v38 = vsel %vm1157_vm5, %v3207_v42, %v3201_v36 }
 0x714   :  { %3211 = vst.msk [vmem:[#allocation7 + $0x8] sm:$0xff] %vm75_vm0, %v3209_v38 }
 0x715   :  { %3652 = shalt.err (!%p3649_p8)
}
 0x716   :  { %s3653_s16 = scalar_lea.hbm %s4780_s8, 256 }
 0x717   :  { %p3654_p9 = scmp.ne.s32.totalorder %s4780_s8, %s3653_s16  ;;  %p3657_p10 = scmp.lt.u32.totalorder %s3653_s16, %s4780_s8 }
 0x719   :  { %p3659_p11 = pnand %p3657_p10, %p3654_p9 }
 0x71b   :  { %3662 = shalt.err (!%p3659_p11)
}
 0x71c   :  { %3223 = dma.vmem_to_hbm [thread:$0]  %s3218_s12, 256, %s4780_s8, [#allocation4], %s3672_s23, %s3672_s23, %s3673_s24  }
 0x71d   :  { %3667 = dma.done.wait [#allocation4], 256  }
 0x71e   :  { %3668 = vsyncadd [#allocation4], 4294967040 }
 0x71f   :  { %3669 = dma.done.wait [#allocation9], 512  }
 0x720   :  { %3670 = vsyncadd [#allocation9], 4294966784 }
 0x721   :  { %3257 = vsyncpa [#allocation3], 1 }
 0x722   :  { %3258 = vsyncpa [#allocation6], 1 }
 0x723   :  { %3259 = vsyncpa [#allocation4], 1 }
 0x724   :  { %3260 = vsyncpa [#allocation9], 1 }

</bundles_post_ra>
